<compile_context>
chip_gen: v7x
topology: tpu7x:2x2x1
jax: 0.10.0
libtpu: 0.0.40
codegen_flags: <defaults>
</compile_context>

<pallas_src>
import functools

import jax
import jax.numpy as jnp
from jax.experimental import pallas as pl
from jax.experimental.pallas import tpu as pltpu

LANE = 128


# ---------------------------------------------------------------------------
# Kernel: one GCN layer.  Grid = (row tiles, K tiles of A_hat's columns).
# ---------------------------------------------------------------------------
def gcn_layer_kernel(a_ref, h_ref, w_ref, b_ref, out_ref, acc_ref, *, apply_relu):
    # a_ref  : [T, T]       bf16 block of normalized adjacency (streamed)
    # h_ref  : [T, C_pad]   bf16 block of input node features (streamed over k)
    # w_ref  : [C_pad, H_pad] f32 weights (VMEM-resident)
    # b_ref  : [1, H_pad]   f32 bias (VMEM-resident)
    # out_ref: [T, H_pad]   bf16 (hidden layers) / f32 (final layer)
    # acc_ref: [T, C_pad]   f32 accumulator for A_hat @ H_in
    k = pl.program_id(1)

    @pl.when(k == 0)
    def _():
        acc_ref[...] = jnp.zeros_like(acc_ref)

    acc_ref[...] += jnp.dot(a_ref[...], h_ref[...],
                            preferred_element_type=jnp.float32)

    @pl.when(k == pl.num_programs(1) - 1)
    def _():
        r = jnp.dot(acc_ref[...], w_ref[...],
                    preferred_element_type=jnp.float32) + b_ref[...]
        if apply_relu:
            r = jnp.maximum(r, 0.0)
        out_ref[...] = r.astype(out_ref.dtype)


# ---------------------------------------------------------------------------
# Helpers
# ---------------------------------------------------------------------------
def _round_up(x, m):
    return ((x + m - 1) // m) * m


def _pad2d(a, rows, cols):
    return jnp.pad(a, ((0, rows - a.shape[0]), (0, cols - a.shape[1])))


def _choose_tiling(n, *, cap=1024, granule=LANE):
    """Balanced square tile <= cap, multiple of `granule`, dividing n_pad."""
    num = max(1, -(-n // cap))
    tile = _round_up(-(-n // num), granule)
    return tile, num * tile


def _vmem_limit_bytes(tile, c_pad, h_pad, out_itemsize):
    bf16, f32 = 2, 4
    a_blk = 2 * tile * tile * bf16          # double-buffered A block
    h_blk = 2 * tile * c_pad * bf16         # double-buffered H block
    w_res = 2 * c_pad * h_pad * f32
    b_res = 2 * 8 * h_pad * f32
    out_blk = 2 * tile * h_pad * out_itemsize
    acc = tile * c_pad * f32
    need = a_blk + h_blk + w_res + b_res + out_blk + acc
    # Headroom x2, at least the default scoped limit, never above v7x physical.
    return int(min(max(2 * need, 32 * 1024 * 1024), 64 * 1024 * 1024))


def _gcn_layer(a_hat, h_in, w, b, *, apply_relu, out_dtype, tile):
    n_pad = a_hat.shape[0]
    c_pad = h_in.shape[1]
    h_pad = w.shape[1]
    grid = (n_pad // tile, n_pad // tile)

    out_itemsize = jnp.dtype(out_dtype).itemsize
    flops = 2 * n_pad * n_pad * c_pad + 2 * n_pad * c_pad * h_pad
    bytes_accessed = (
        n_pad * n_pad * 2                       # A_hat (bf16), streamed once
        + grid[0] * n_pad * c_pad * 2           # H_in re-read once per row tile
        + c_pad * h_pad * 4 + h_pad * 4         # W, bias
        + n_pad * h_pad * out_itemsize)         # output

    kernel = functools.partial(gcn_layer_kernel, apply_relu=apply_relu)
    return pl.pallas_call(
        kernel,
        out_shape=jax.ShapeDtypeStruct((n_pad, h_pad), out_dtype),
        grid_spec=pltpu.PrefetchScalarGridSpec(
            num_scalar_prefetch=0,
            grid=grid,
            in_specs=[
                pl.BlockSpec((tile, tile), lambda i, k: (i, k)),     # A block
                pl.BlockSpec((tile, c_pad), lambda i, k: (k, 0)),    # H block
                pl.BlockSpec((c_pad, h_pad), lambda i, k: (0, 0)),   # W resident
                pl.BlockSpec((1, h_pad), lambda i, k: (0, 0)),       # bias
            ],
            out_specs=pl.BlockSpec((tile, h_pad), lambda i, k: (i, 0)),
            scratch_shapes=[pltpu.VMEM((tile, c_pad), jnp.float32)],
        ),
        compiler_params=pltpu.CompilerParams(
            dimension_semantics=("parallel", "arbitrary"),
            vmem_limit_bytes=_vmem_limit_bytes(tile, c_pad, h_pad, out_itemsize),
        ),
        cost_estimate=pl.CostEstimate(
            flops=flops, transcendentals=0, bytes_accessed=bytes_accessed),
    )(a_hat, h_in, w, b)


def build_normalized_adjacency(edge_index, num_nodes):
    """Dense D^-1/2 (A + I_remaining) D^-1/2, mirroring PyG gcn_norm."""
    src = edge_index[0]
    dst = edge_index[1]
    a = jnp.zeros((num_nodes, num_nodes), jnp.float32)
    a = a.at[dst, src].add(1.0)                  # A[target, source]
    # add_remaining_self_loops: weight-1 loop only for nodes without one.
    diag = jnp.diagonal(a)
    a = a + jnp.diag(jnp.where(diag > 0.0, 0.0, 1.0))
    deg = jnp.sum(a, axis=1)
    dinv = jnp.where(deg > 0, jax.lax.rsqrt(deg), 0.0)
    return dinv[:, None] * a * dinv[None, :]


# ---------------------------------------------------------------------------
# Forward pass: 3 x (GCNConv [+ ReLU])
# ---------------------------------------------------------------------------
def gcn_encoder_forward(x, edge_index, params, *, tile_cap=1024):
    n, c = x.shape
    hidden = params["w1"].shape[1]

    c_pad = _round_up(c, LANE)
    h_pad = _round_up(hidden, LANE)
    tile, n_pad = _choose_tiling(n, cap=tile_cap)

    # Dense normalized adjacency (JAX glue), streamed into the kernel as bf16.
    a_hat = _pad2d(build_normalized_adjacency(edge_index, n),
                   n_pad, n_pad).astype(jnp.bfloat16)

    h0 = _pad2d(x.astype(jnp.float32), n_pad, c_pad).astype(jnp.bfloat16)

    w1 = _pad2d(params["w1"], c_pad, h_pad)
    b1 = _pad2d(params["b1"].reshape(1, -1), 1, h_pad)
    w2 = _pad2d(params["w2"], h_pad, h_pad)
    b2 = _pad2d(params["b2"].reshape(1, -1), 1, h_pad)
    w3 = _pad2d(params["w3"], h_pad, h_pad)
    b3 = _pad2d(params["b3"].reshape(1, -1), 1, h_pad)

    h1 = _gcn_layer(a_hat, h0, w1, b1, apply_relu=True,
                    out_dtype=jnp.bfloat16, tile=tile)
    h2 = _gcn_layer(a_hat, h1, w2, b2, apply_relu=True,
                    out_dtype=jnp.bfloat16, tile=tile)
    h3 = _gcn_layer(a_hat, h2, w3, b3, apply_relu=False,
                    out_dtype=jnp.float32, tile=tile)
    return h3[:n, :hidden]


# ---------------------------------------------------------------------------
# Parameters + references
# ---------------------------------------------------------------------------
def init_params(key, in_channels, hidden_channels):
    k1, k2, k3 = jax.random.split(key, 3)

    def glorot(k, fan_in, fan_out):
        limit = jnp.sqrt(6.0 / (fan_in + fan_out))
        return jax.random.uniform(k, (fan_in, fan_out), jnp.float32, -limit, limit)

    return {
        "w1": glorot(k1, in_channels, hidden_channels),
        "b1": jnp.zeros((hidden_channels,), jnp.float32),
        "w2": glorot(k2, hidden_channels, hidden_channels),
        "b2": jnp.zeros((hidden_channels,), jnp.float32),
        "w3": glorot(k3, hidden_channels, hidden_channels),
        "b3": jnp.zeros((hidden_channels,), jnp.float32),
    }


def gcn_reference_matched(x, edge_index, params):
    """Pure-JAX reference mirroring the kernel's dtype/ordering choices."""
    a = build_normalized_adjacency(edge_index, x.shape[0]).astype(jnp.bfloat16)

    def layer(h, w, b, relu):
        ah = jnp.dot(a, h, preferred_element_type=jnp.float32)
        r = jnp.dot(ah, w, preferred_element_type=jnp.float32) + b
        return jnp.maximum(r, 0.0) if relu else r

    h1 = layer(x.astype(jnp.bfloat16), params["w1"], params["b1"], True)
    h2 = layer(h1.astype(jnp.bfloat16), params["w2"], params["b2"], True)
    return layer(h2.astype(jnp.bfloat16), params["w3"], params["b3"], False)


def gcn_reference_f32(x, edge_index, params):
    """Full-f32 PyG-style reference (original A @ (H @ W) ordering)."""
    a = build_normalized_adjacency(edge_index, x.shape[0])
    h = jax.nn.relu(a @ (x @ params["w1"]) + params["b1"])
    h = jax.nn.relu(a @ (h @ params["w2"]) + params["b2"])
    return a @ (h @ params["w3"]) + params["b3"]


# ---------------------------------------------------------------------------
if __name__ == "__main__":
    num_nodes = 200
    in_channels = 16
    hidden_channels = 32
    num_edges = 800

    key = jax.random.PRNGKey(0)
    kx, ke, kp = jax.random.split(key, 3)

    x = jax.random.normal(kx, (num_nodes, in_channels), jnp.float32)
    edge_index = jax.random.randint(ke, (2, num_edges), 0, num_nodes, dtype=jnp.int32)
    params = init_params(kp, in_channels, hidden_channels)

    fwd = jax.jit(gcn_encoder_forward)
    out = fwd(x, edge_index, params)
    jax.block_until_ready(out)
    assert out.shape == (num_nodes, hidden_channels)

    # Tight check vs. a reference with the same bf16/ordering choices.
    ref_matched = gcn_reference_matched(x, edge_index, params)
    assert jnp.allclose(out, ref_matched, atol=1e-3, rtol=1e-3)

    # Loose check vs. the original full-f32 GCN math (bf16 A/H rounding only).
    ref_f32 = gcn_reference_f32(x, edge_index, params)
    assert jnp.allclose(out, ref_f32, atol=5e-2, rtol=5e-2)

    print("KERNEL_OK")
</pallas_src>

<mosaic_0001>
module attributes {stable_mosaic.version = 11 : i64} {
  func.func private @main(%arg0: i32) attributes {dimension_semantics = [#tpu.dimension_semantics<core_parallel>], iteration_bounds = array<i64: 2>, tpu.core_type = #tpu.core_type<sc_scalar_subcore>, window_params = []} {
    return
  }
}

module attributes {stable_mosaic.version = 11 : i64} {
  func.func private @main(%arg0: i32) attributes {dimension_semantics = [#tpu.dimension_semantics<core_parallel>], iteration_bounds = array<i64: 2>, tpu.core_type = #tpu.core_type<sc_scalar_subcore>, window_params = []} {
    return
  }
}

module attributes {stable_mosaic.version = 11 : i64} {
  func.func @gcn_layer_kernel(%arg0: i32, %arg1: i32, %arg2: memref<256x256xbf16, #tpu.memory_space<vmem>>, %arg3: memref<256x128xbf16, #tpu.memory_space<vmem>>, %arg4: memref<128x128xf32, #tpu.memory_space<vmem>>, %arg5: memref<1x128xf32, #tpu.memory_space<vmem>>, %arg6: memref<256x128xf32, #tpu.memory_space<vmem>>, %arg7: memref<256x128xf32, #tpu.memory_space<vmem>>) attributes {dimension_semantics = [#tpu.dimension_semantics<parallel>, #tpu.dimension_semantics<arbitrary>], iteration_bounds = array<i64: 1, 1>, scalar_prefetch = 0 : i64, scratch_operands = 1 : i64, tpu.core_type = #tpu.core_type<tc>, window_params = [{transform_indices = @transform_0, window_bounds = array<i64: 256, 256>}, {transform_indices = @transform_1, window_bounds = array<i64: 256, 128>}, {pipeline_mode = #tpu.pipeline_mode<synchronous>, transform_indices = @transform_2, window_bounds = array<i64: 128, 128>}, {pipeline_mode = #tpu.pipeline_mode<synchronous>, transform_indices = @transform_3, window_bounds = array<i64: 1, 128>}, {transform_indices = @transform_4, window_bounds = array<i64: 256, 128>}]} {
    %c0_i32 = arith.constant 0 : i32
    %0 = arith.cmpi eq, %arg1, %c0_i32 : i32
    %1 = arith.extui %0 : i1 to i32
    %c0_i32_0 = arith.constant 0 : i32
    %2 = arith.cmpi ne, %1, %c0_i32_0 : i32
    scf.if %2 {
      %cst_10 = arith.constant 0.000000e+00 : f32
      %12 = vector.broadcast %cst_10 : f32 to vector<256x128xf32>
      %c0_11 = arith.constant 0 : index
      %c0_12 = arith.constant 0 : index
      %13 = vector.load %arg7[%c0_11, %c0_12] : memref<256x128xf32, #tpu.memory_space<vmem>>, vector<256x128xf32>
      tpu.vector_store %arg7[%c0_11, %c0_12], %12 {strides = array<i32>} : memref<256x128xf32, #tpu.memory_space<vmem>>, vector<256x128xf32>,
    } else {
    }
    %c0 = arith.constant 0 : index
    %c0_1 = arith.constant 0 : index
    %3 = vector.load %arg7[%c0, %c0_1] : memref<256x128xf32, #tpu.memory_space<vmem>>, vector<256x128xf32>
    %c0_2 = arith.constant 0 : index
    %c0_3 = arith.constant 0 : index
    %4 = vector.load %arg2[%c0_2, %c0_3] : memref<256x256xbf16, #tpu.memory_space<vmem>>, vector<256x256xbf16>
    %c0_4 = arith.constant 0 : index
    %c0_5 = arith.constant 0 : index
    %5 = vector.load %arg3[%c0_4, %c0_5] : memref<256x128xbf16, #tpu.memory_space<vmem>>, vector<256x128xbf16>
    %cst = arith.constant dense<0.000000e+00> : vector<256x128xf32>
    %6 = tpu.matmul %4, %5, %cst {dimension_numbers = #tpu.dot_dimension_numbers<[1], [0], [0], [1], [0, 0, 1, 1], [], []>} : vector<256x256xbf16>, vector<256x128xbf16>, vector<256x128xf32> -> vector<256x128xf32>
    %7 = arith.addf %3, %6 : vector<256x128xf32>
    %c0_6 = arith.constant 0 : index
    %c0_7 = arith.constant 0 : index
    %8 = vector.load %arg7[%c0_6, %c0_7] : memref<256x128xf32, #tpu.memory_space<vmem>>, vector<256x128xf32>
    tpu.vector_store %arg7[%c0_6, %c0_7], %7 {strides = array<i32>} : memref<256x128xf32, #tpu.memory_space<vmem>>, vector<256x128xf32>,
    %c0_i32_8 = arith.constant 0 : i32
    %9 = arith.cmpi eq, %arg1, %c0_i32_8 : i32
    %10 = arith.extui %9 : i1 to i32
    %c0_i32_9 = arith.constant 0 : i32
    %11 = arith.cmpi ne, %10, %c0_i32_9 : i32
    scf.if %11 {
      %c0_10 = arith.constant 0 : index
      %c0_11 = arith.constant 0 : index
      %12 = vector.load %arg7[%c0_10, %c0_11] : memref<256x128xf32, #tpu.memory_space<vmem>>, vector<256x128xf32>
      %c0_12 = arith.constant 0 : index
      %c0_13 = arith.constant 0 : index
      %13 = vector.load %arg4[%c0_12, %c0_13] : memref<128x128xf32, #tpu.memory_space<vmem>>, vector<128x128xf32>
      %cst_14 = arith.constant dense<0.000000e+00> : vector<256x128xf32>
      %14 = tpu.matmul %12, %13, %cst_14 {dimension_numbers = #tpu.dot_dimension_numbers<[1], [0], [0], [1], [0, 0, 1, 1], [], []>} : vector<256x128xf32>, vector<128x128xf32>, vector<256x128xf32> -> vector<256x128xf32>
      %c0_15 = arith.constant 0 : index
      %c0_16 = arith.constant 0 : index
      %15 = vector.load %arg5[%c0_15, %c0_16] : memref<1x128xf32, #tpu.memory_space<vmem>>, vector<1x128xf32>
      %16 = vector.broadcast %15 : vector<1x128xf32> to vector<256x128xf32>
      %17 = arith.addf %14, %16 : vector<256x128xf32>
      %c0_17 = arith.constant 0 : index
      %c0_18 = arith.constant 0 : index
      %18 = vector.load %arg6[%c0_17, %c0_18] : memref<256x128xf32, #tpu.memory_space<vmem>>, vector<256x128xf32>
      tpu.vector_store %arg6[%c0_17, %c0_18], %17 {strides = array<i32>} : memref<256x128xf32, #tpu.memory_space<vmem>>, vector<256x128xf32>,
    } else {
    }
    return
  }
  func.func @transform_0(%arg0: i32, %arg1: i32) -> (i32, i32) {
    %c0_i32 = arith.constant 0 : i32
    return %arg0, %arg1 : i32, i32
  }
  func.func @transform_1(%arg0: i32, %arg1: i32) -> (i32, i32) {
    %c0_i32 = arith.constant 0 : i32
    %c0_i32_0 = arith.constant 0 : i32
    return %arg1, %c0_i32 : i32, i32
  }
  func.func @transform_2(%arg0: i32, %arg1: i32) -> (i32, i32) {
    %c0_i32 = arith.constant 0 : i32
    %c0_i32_0 = arith.constant 0 : i32
    %c0_i32_1 = arith.constant 0 : i32
    return %c0_i32, %c0_i32_0 : i32, i32
  }
  func.func @transform_3(%arg0: i32, %arg1: i32) -> (i32, i32) {
    %c0_i32 = arith.constant 0 : i32
    %c0_i32_0 = arith.constant 0 : i32
    %c0_i32_1 = arith.constant 0 : i32
    return %c0_i32, %c0_i32_0 : i32, i32
  }
  func.func @transform_4(%arg0: i32, %arg1: i32) -> (i32, i32) {
    %c0_i32 = arith.constant 0 : i32
    %c0_i32_0 = arith.constant 0 : i32
    return %arg0, %c0_i32 : i32, i32
  }
}

module attributes {stable_mosaic.version = 11 : i64} {
  func.func @gcn_layer_kernel(%arg0: i32, %arg1: i32, %arg2: memref<256x256xbf16, #tpu.memory_space<vmem>>, %arg3: memref<256x128xbf16, #tpu.memory_space<vmem>>, %arg4: memref<128x128xf32, #tpu.memory_space<vmem>>, %arg5: memref<1x128xf32, #tpu.memory_space<vmem>>, %arg6: memref<256x128xbf16, #tpu.memory_space<vmem>>, %arg7: memref<256x128xf32, #tpu.memory_space<vmem>>) attributes {dimension_semantics = [#tpu.dimension_semantics<parallel>, #tpu.dimension_semantics<arbitrary>], iteration_bounds = array<i64: 1, 1>, scalar_prefetch = 0 : i64, scratch_operands = 1 : i64, tpu.core_type = #tpu.core_type<tc>, window_params = [{transform_indices = @transform_0, window_bounds = array<i64: 256, 256>}, {transform_indices = @transform_1, window_bounds = array<i64: 256, 128>}, {pipeline_mode = #tpu.pipeline_mode<synchronous>, transform_indices = @transform_2, window_bounds = array<i64: 128, 128>}, {pipeline_mode = #tpu.pipeline_mode<synchronous>, transform_indices = @transform_3, window_bounds = array<i64: 1, 128>}, {transform_indices = @transform_4, window_bounds = array<i64: 256, 128>}]} {
    %c0_i32 = arith.constant 0 : i32
    %0 = arith.cmpi eq, %arg1, %c0_i32 : i32
    %1 = arith.extui %0 : i1 to i32
    %c0_i32_0 = arith.constant 0 : i32
    %2 = arith.cmpi ne, %1, %c0_i32_0 : i32
    scf.if %2 {
      %cst_10 = arith.constant 0.000000e+00 : f32
      %12 = vector.broadcast %cst_10 : f32 to vector<256x128xf32>
      %c0_11 = arith.constant 0 : index
      %c0_12 = arith.constant 0 : index
      %13 = vector.load %arg7[%c0_11, %c0_12] : memref<256x128xf32, #tpu.memory_space<vmem>>, vector<256x128xf32>
      tpu.vector_store %arg7[%c0_11, %c0_12], %12 {strides = array<i32>} : memref<256x128xf32, #tpu.memory_space<vmem>>, vector<256x128xf32>,
    } else {
    }
    %c0 = arith.constant 0 : index
    %c0_1 = arith.constant 0 : index
    %3 = vector.load %arg7[%c0, %c0_1] : memref<256x128xf32, #tpu.memory_space<vmem>>, vector<256x128xf32>
    %c0_2 = arith.constant 0 : index
    %c0_3 = arith.constant 0 : index
    %4 = vector.load %arg2[%c0_2, %c0_3] : memref<256x256xbf16, #tpu.memory_space<vmem>>, vector<256x256xbf16>
    %c0_4 = arith.constant 0 : index
    %c0_5 = arith.constant 0 : index
    %5 = vector.load %arg3[%c0_4, %c0_5] : memref<256x128xbf16, #tpu.memory_space<vmem>>, vector<256x128xbf16>
    %cst = arith.constant dense<0.000000e+00> : vector<256x128xf32>
    %6 = tpu.matmul %4, %5, %cst {dimension_numbers = #tpu.dot_dimension_numbers<[1], [0], [0], [1], [0, 0, 1, 1], [], []>} : vector<256x256xbf16>, vector<256x128xbf16>, vector<256x128xf32> -> vector<256x128xf32>
    %7 = arith.addf %3, %6 : vector<256x128xf32>
    %c0_6 = arith.constant 0 : index
    %c0_7 = arith.constant 0 : index
    %8 = vector.load %arg7[%c0_6, %c0_7] : memref<256x128xf32, #tpu.memory_space<vmem>>, vector<256x128xf32>
    tpu.vector_store %arg7[%c0_6, %c0_7], %7 {strides = array<i32>} : memref<256x128xf32, #tpu.memory_space<vmem>>, vector<256x128xf32>,
    %c0_i32_8 = arith.constant 0 : i32
    %9 = arith.cmpi eq, %arg1, %c0_i32_8 : i32
    %10 = arith.extui %9 : i1 to i32
    %c0_i32_9 = arith.constant 0 : i32
    %11 = arith.cmpi ne, %10, %c0_i32_9 : i32
    scf.if %11 {
      %c0_10 = arith.constant 0 : index
      %c0_11 = arith.constant 0 : index
      %12 = vector.load %arg7[%c0_10, %c0_11] : memref<256x128xf32, #tpu.memory_space<vmem>>, vector<256x128xf32>
      %c0_12 = arith.constant 0 : index
      %c0_13 = arith.constant 0 : index
      %13 = vector.load %arg4[%c0_12, %c0_13] : memref<128x128xf32, #tpu.memory_space<vmem>>, vector<128x128xf32>
      %cst_14 = arith.constant dense<0.000000e+00> : vector<256x128xf32>
      %14 = tpu.matmul %12, %13, %cst_14 {dimension_numbers = #tpu.dot_dimension_numbers<[1], [0], [0], [1], [0, 0, 1, 1], [], []>} : vector<256x128xf32>, vector<128x128xf32>, vector<256x128xf32> -> vector<256x128xf32>
      %c0_15 = arith.constant 0 : index
      %c0_16 = arith.constant 0 : index
      %15 = vector.load %arg5[%c0_15, %c0_16] : memref<1x128xf32, #tpu.memory_space<vmem>>, vector<1x128xf32>
      %16 = vector.broadcast %15 : vector<1x128xf32> to vector<256x128xf32>
      %17 = arith.addf %14, %16 : vector<256x128xf32>
      %cst_17 = arith.constant 0.000000e+00 : f32
      %18 = vector.broadcast %cst_17 : f32 to vector<256x128xf32>
      %19 = arith.maximumf %17, %18 : vector<256x128xf32>
      %20 = arith.truncf %19 : vector<256x128xf32> to vector<256x128xbf16>
      %c0_18 = arith.constant 0 : index
      %c0_19 = arith.constant 0 : index
      %21 = vector.load %arg6[%c0_18, %c0_19] : memref<256x128xbf16, #tpu.memory_space<vmem>>, vector<256x128xbf16>
      tpu.vector_store %arg6[%c0_18, %c0_19], %20 {strides = array<i32>} : memref<256x128xbf16, #tpu.memory_space<vmem>>, vector<256x128xbf16>,
    } else {
    }
    return
  }
  func.func @transform_0(%arg0: i32, %arg1: i32) -> (i32, i32) {
    %c0_i32 = arith.constant 0 : i32
    return %arg0, %arg1 : i32, i32
  }
  func.func @transform_1(%arg0: i32, %arg1: i32) -> (i32, i32) {
    %c0_i32 = arith.constant 0 : i32
    %c0_i32_0 = arith.constant 0 : i32
    return %arg1, %c0_i32 : i32, i32
  }
  func.func @transform_2(%arg0: i32, %arg1: i32) -> (i32, i32) {
    %c0_i32 = arith.constant 0 : i32
    %c0_i32_0 = arith.constant 0 : i32
    %c0_i32_1 = arith.constant 0 : i32
    return %c0_i32, %c0_i32_0 : i32, i32
  }
  func.func @transform_3(%arg0: i32, %arg1: i32) -> (i32, i32) {
    %c0_i32 = arith.constant 0 : i32
    %c0_i32_0 = arith.constant 0 : i32
    %c0_i32_1 = arith.constant 0 : i32
    return %c0_i32, %c0_i32_0 : i32, i32
  }
  func.func @transform_4(%arg0: i32, %arg1: i32) -> (i32, i32) {
    %c0_i32 = arith.constant 0 : i32
    %c0_i32_0 = arith.constant 0 : i32
    return %arg0, %c0_i32 : i32, i32
  }
}

</mosaic_0001>

<bundles_post_ra>
// kernel: gcn_encoder_forward.5
= control target key start
LH: loop header
LB: loop body
LE: loop exit
PB: predicated region body
PF: predicated region fallthrough
CT: control target
= control target key end

     0   :  { %s1725_s1 = inlined_call_operand.vmem [shape: bf16[256,128], index: 1, kind: input, shape index: {}]   ;;  %s1726_s0 = inlined_call_operand.vmem [shape: bf16[256,256], index: 0, kind: input, shape index: {}]   ;;  %s1727_s2 = inlined_call_operand.vmem [shape: f32[128,128], index: 2, kind: input, shape index: {}]   ;;  %s1728_s3 = inlined_call_operand.vmem [shape: f32[1,128], index: 3, kind: input, shape index: {}]   ;;  %s1729_s4 = inlined_call_operand.vmem [shape: f32[256,128], index: 4, kind: output, shape index: {}]  }
   0x1   :  { %v1287_v0 = vld [vmem:[%s1725_s1 + $0x40] sm:$0xff]   ;;  %v1289_v2 = vld [vmem:[%s1725_s1 + $0x48] sm:$0xff]   ;;  %v1291_v4 = vld [vmem:[%s1725_s1 + $0x50] sm:$0xff]  }
   0x2   :  { %v1288_v1 = vld [vmem:[%s1725_s1] sm:$0xff]   ;;  %999 = vmatprep.subr.bf16.mxu0 %v1287_v0  ;;  %1271 = vmatprep.subr.bf16.mxu1 %v1287_v0  ;;  %v1290_v3 = vld [vmem:[%s1725_s1 + $0x8] sm:$0xff]   ;;  %v1292_v5 = vld [vmem:[%s1725_s1 + $0x10] sm:$0xff]  }
   0x3   :  { %1000 = vmatpush3.bf16.msra.mxu0 %v1288_v1  ;;  %1279 = vmatpush3.bf16.msra.mxu1 %v1288_v1  ;;  %v1293_v6 = vld [vmem:[%s1725_s1 + $0x58] sm:$0xff]   ;;  %v1295_v8 = vld [vmem:[%s1725_s1 + $0x60] sm:$0xff]   ;;  %v1297_v10 = vld [vmem:[%s1725_s1 + $0x68] sm:$0xff]  }
   0x4   :  { %1001 = vmatprep.subr.bf16.mxu0 %v1289_v2  ;;  %1272 = vmatprep.subr.bf16.mxu1 %v1289_v2  ;;  %v1294_v7 = vld [vmem:[%s1725_s1 + $0x18] sm:$0xff]   ;;  %v1296_v9 = vld [vmem:[%s1725_s1 + $0x20] sm:$0xff]   ;;  %v1298_v12 = vld [vmem:[%s1725_s1 + $0x28] sm:$0xff]  }
   0x5   :  { %v1305_v11 = vld [vmem:[%s1726_s0 + $0x4] ss:$8 sps:$4 sm:$0xff]   ;;  %v1299_v13 = vld [vmem:[%s1725_s1 + $0x70] sm:$0xff]   ;;  %v1301_v15 = vld [vmem:[%s1725_s1 + $0x78] sm:$0xff]  }
   0x6   :  { %438 = vmatprep.mubr.bf16.mxu0 %v1305_v11  ;;  %v1300_v14 = vld [vmem:[%s1725_s1 + $0x30] sm:$0xff]   ;;  %v1302_v16 = vld [vmem:[%s1725_s1 + $0x38] sm:$0xff]   ;;  %v1303_v17 = vld [vmem:[%s1726_s0] ss:$8 sps:$4 sm:$0xff]  }
   0x7   :  { %1002 = vmatpush3.bf16.msra.mxu0 %v1290_v3  ;;  %1280 = vmatpush3.bf16.msra.mxu1 %v1290_v3  ;;  %v1335_v18 = vld [vmem:[%s1726_s0 + $0xc4] ss:$8 sps:$4 sm:$0xff]   ;;  %v1306_v19 = vld [vmem:[%s1726_s0 + $0x14] ss:$8 sps:$4 sm:$0xff]   ;;  %v1333_v20 = vld [vmem:[%s1726_s0 + $0xc0] ss:$8 sps:$4 sm:$0xff]  }
   0x8   :  { %1003 = vmatprep.subr.bf16.mxu0 %v1291_v4  ;;  %1273 = vmatprep.subr.bf16.mxu1 %v1291_v4  ;;  %v1339_v21 = vld [vmem:[%s1726_s0 + $0xd4] ss:$8 sps:$4 sm:$0xff]   ;;  %v1308_v22 = vld [vmem:[%s1726_s0 + $0x10] ss:$8 sps:$4 sm:$0xff]   ;;  %v666_v23 = vld [vmem:[%s1727_s2] sm:$0xff] }
   0x9   :  { %534 = vmatprep.mubr.bf16.mxu1 %v1335_v18  ;;  %v667_v24 = vld [vmem:[%s1727_s2 + $0x8] sm:$0xff]  ;;  %v668_v27 = vld [vmem:[%s1727_s2 + $0x10] sm:$0xff]  ;;  %v669_v28 = vld [vmem:[%s1727_s2 + $0x18] sm:$0xff] }
   0xa   :  { %v1309_v25 = vld [vmem:[%s1726_s0 + $0x24] ss:$8 sps:$4 sm:$0xff]   ;;  %v1239_v26 = vpack.c.bf16 %v667_v24, %v666_v23  ;;  %v1341_v29 = vld [vmem:[%s1726_s0 + $0xd0] ss:$8 sps:$4 sm:$0xff]   ;;  %v1243_v30 = vpack.c.bf16 %v669_v28, %v668_v27  ;;  %v1311_v37 = vld [vmem:[%s1726_s0 + $0x20] ss:$8 sps:$4 sm:$0xff]  }
   0xb   :  { %1004 = vmatpush3.bf16.msra.mxu0 %v1292_v5  ;;  %1281 = vmatpush3.bf16.msra.mxu1 %v1292_v5  ;;  %v670_v31 = vld [vmem:[%s1727_s2 + $0x20] sm:$0xff]  ;;  %v671_v32 = vld [vmem:[%s1727_s2 + $0x28] sm:$0xff]  ;;  %v672_v35 = vld [vmem:[%s1727_s2 + $0x30] sm:$0xff] }
   0xc   :  { %1005 = vmatprep.subr.bf16.mxu0 %v1293_v6  ;;  %1274 = vmatprep.subr.bf16.mxu1 %v1293_v6  ;;  %v1345_v33 = vld [vmem:[%s1726_s0 + $0xe4] ss:$8 sps:$4 sm:$0xff]   ;;  %v1247_v34 = vpack.c.bf16 %v671_v32, %v670_v31  ;;  %v673_v36 = vld [vmem:[%s1727_s2 + $0x38] sm:$0xff]  ;;  %v1347_v40 = vld [vmem:[%s1726_s0 + $0xe0] ss:$8 sps:$4 sm:$0xff]  }
   0xd   :  { %v1312_v38 = vld [vmem:[%s1726_s0 + $0x34] ss:$8 sps:$4 sm:$0xff]   ;;  %v1251_v39 = vpack.c.bf16 %v673_v36, %v672_v35  ;;  %v674_v41 = vld [vmem:[%s1727_s2 + $0x40] sm:$0xff]  ;;  %v675_v42 = vld [vmem:[%s1727_s2 + $0x48] sm:$0xff] }
   0xe   :  { %v1348_v43 = vld [vmem:[%s1726_s0 + $0xf4] ss:$8 sps:$4 sm:$0xff]   ;;  %v1255_v44 = vpack.c.bf16 %v675_v42, %v674_v41  ;;  %v1314_v47 = vld [vmem:[%s1726_s0 + $0x30] ss:$8 sps:$4 sm:$0xff]   ;;  %v1315_v48 = vld [vmem:[%s1726_s0 + $0x44] ss:$8 sps:$4 sm:$0xff]  }
   0xf   :  { %1006 = vmatpush3.bf16.msra.mxu0 %v1294_v7  ;;  %1282 = vmatpush3.bf16.msra.mxu1 %v1294_v7  ;;  %v676_v45 = vld [vmem:[%s1727_s2 + $0x50] sm:$0xff]  ;;  %v677_v46 = vld [vmem:[%s1727_s2 + $0x58] sm:$0xff]  ;;  %v678_v51 = vld [vmem:[%s1727_s2 + $0x60] sm:$0xff] }
  0x10   :  { %1007 = vmatprep.subr.bf16.mxu0 %v1295_v8  ;;  %1275 = vmatprep.subr.bf16.mxu1 %v1295_v8  ;;  %v1259_v49 = vpack.c.bf16 %v677_v46, %v676_v45  ;;  %v1350_v50 = vld [vmem:[%s1726_s0 + $0xf0] ss:$8 sps:$4 sm:$0xff]   ;;  %v679_v52 = vld [vmem:[%s1727_s2 + $0x68] sm:$0xff]  ;;  %v1318_v55 = vld [vmem:[%s1726_s0 + $0x54] ss:$8 sps:$4 sm:$0xff]  }
  0x11   :  { %v1263_v53 = vpack.c.bf16 %v679_v52, %v678_v51  ;;  %v1317_v54 = vld [vmem:[%s1726_s0 + $0x40] ss:$8 sps:$4 sm:$0xff]   ;;  %v1320_v56 = vld [vmem:[%s1726_s0 + $0x50] ss:$8 sps:$4 sm:$0xff]   ;;  %v1321_v57 = vld [vmem:[%s1726_s0 + $0x64] ss:$8 sps:$4 sm:$0xff]  }
  0x12   :  { %v1323_v58 = vld [vmem:[%s1726_s0 + $0x60] ss:$8 sps:$4 sm:$0xff]   ;;  %v1324_v59 = vld [vmem:[%s1726_s0 + $0x74] ss:$8 sps:$4 sm:$0xff]   ;;  %v1326_v60 = vld [vmem:[%s1726_s0 + $0x70] ss:$8 sps:$4 sm:$0xff]  }
  0x13   :  { %1008 = vmatpush3.bf16.msra.mxu0 %v1296_v9  ;;  %1283 = vmatpush3.bf16.msra.mxu1 %v1296_v9  ;;  %v1327_v61 = vld [vmem:[%s1726_s0 + $0x84] ss:$8 sps:$4 sm:$0xff]   ;;  %v1329_v62 = vld [vmem:[%s1726_s0 + $0x80] ss:$8 sps:$4 sm:$0xff]   ;;  %v1330_v63 = vld [vmem:[%s1726_s0 + $0x94] ss:$8 sps:$4 sm:$0xff]  }
  0x14   :  { %1009 = vmatprep.subr.bf16.mxu0 %v1297_v10  ;;  %1276 = vmatprep.subr.bf16.mxu1 %v1297_v10  ;;  %v1332_v0 = vld [vmem:[%s1726_s0 + $0x90] ss:$8 sps:$4 sm:$0xff]   ;;  %v1336_v1 = vld [vmem:[%s1726_s0 + $0xa4] ss:$8 sps:$4 sm:$0xff]   ;;  %v1338_v2 = vld [vmem:[%s1726_s0 + $0xa0] ss:$8 sps:$4 sm:$0xff]  }
  0x15   :  { %v1342_v3 = vld [vmem:[%s1726_s0 + $0xb4] ss:$8 sps:$4 sm:$0xff]   ;;  %v1344_v7 = vld [vmem:[%s1726_s0 + $0xb0] ss:$8 sps:$4 sm:$0xff]  }
  0x16   :  { %v680_v4 = vld [vmem:[%s1727_s2 + $0x70] sm:$0xff]  ;;  %v681_v5 = vld [vmem:[%s1727_s2 + $0x78] sm:$0xff] }
  0x17   :  { %1010 = vmatpush3.bf16.msra.mxu0 %v1298_v12  ;;  %1284 = vmatpush3.bf16.msra.mxu1 %v1298_v12  ;;  %v1267_v6 = vpack.c.bf16 %v681_v5, %v680_v4 }
  0x18   :  { %1011 = vmatprep.subr.bf16.mxu0 %v1299_v13  ;;  %1277 = vmatprep.subr.bf16.mxu1 %v1299_v13 }
  0x1b   :  { %1012 = vmatpush3.bf16.msra.mxu0 %v1300_v14  ;;  %1285 = vmatpush3.bf16.msra.mxu1 %v1300_v14 }
  0x1c   :  { %1013 = vmatprep.subr.bf16.mxu0 %v1301_v15  ;;  %1278 = vmatprep.subr.bf16.mxu1 %v1301_v15 }
  0x1f   :  { %1014 = vmatpush3.bf16.msra.mxu0 %v1302_v16  ;;  %1286 = vmatpush3.bf16.msra.mxu1 %v1302_v16 }
  0x20   :  { %1240 = vmatprep.subr.bf16.mxu1 %v1239_v26 }
  0x22   :  { %439 = vmatmul.mubr.bf16.vlgmr.msra.gmra.mrb[0].mxu0 %v1303_v17  ;;  %535 = vmatmul.mubr.bf16.vlgmr.msra.gmra.mrb[0].mxu1 %v1333_v20 }
  0x23   :  { %446 = vmatprep.mubr.bf16.mxu0 %v1306_v19  ;;  %542 = vmatprep.mubr.bf16.mxu1 %v1339_v21 }
  0x24   :  { %1242 = vmatpush3.bf16.msra.mxu1 %v1239_v26 }
  0x25   :  { %1244 = vmatprep.subr.bf16.mxu1 %v1243_v30 }
  0x28   :  { %1246 = vmatpush3.bf16.msra.mxu1 %v1243_v30 }
  0x29   :  { %1248 = vmatprep.subr.bf16.mxu1 %v1247_v34 }
  0x2a   :  { %447 = vmatmul.mubr.bf16.gmra.mrb[4].mxu0 %v1308_v22  ;;  %543 = vmatmul.mubr.bf16.gmra.mrb[4].mxu1 %v1341_v29 }
  0x2b   :  { %454 = vmatprep.mubr.bf16.mxu0 %v1309_v25  ;;  %550 = vmatprep.mubr.bf16.mxu1 %v1345_v33 }
  0x2c   :  { %1250 = vmatpush3.bf16.msra.mxu1 %v1247_v34 }
  0x2d   :  { %1252 = vmatprep.subr.bf16.mxu1 %v1251_v39 }
  0x30   :  { %1254 = vmatpush3.bf16.msra.mxu1 %v1251_v39 }
  0x31   :  { %1256 = vmatprep.subr.bf16.mxu1 %v1255_v44 }
  0x32   :  { %455 = vmatmul.mubr.bf16.gmra.mrb[8].mxu0 %v1311_v37  ;;  %551 = vmatmul.mubr.bf16.gmra.mrb[8].mxu1 %v1347_v40 }
  0x33   :  { %462 = vmatprep.mubr.bf16.mxu0 %v1312_v38  ;;  %558 = vmatprep.mubr.bf16.mxu1 %v1348_v43 }
  0x34   :  { %1258 = vmatpush3.bf16.msra.mxu1 %v1255_v44 }
  0x35   :  { %1260 = vmatprep.subr.bf16.mxu1 %v1259_v49 }
  0x38   :  { %1262 = vmatpush3.bf16.msra.mxu1 %v1259_v49 }
  0x39   :  { %1264 = vmatprep.subr.bf16.mxu1 %v1263_v53 }
  0x3a   :  { %463 = vmatmul.mubr.bf16.gmra.mrb[12].mxu0 %v1314_v47  ;;  %559 = vmatmul.mubr.bf16.gmra.mrb[12].mxu1 %v1350_v50 }
  0x3b   :  { %470 = vmatprep.mubr.bf16.mxu0 %v1315_v48 }
  0x3c   :  { %1266 = vmatpush3.bf16.msra.mxu1 %v1263_v53 }
  0x3d   :  { %1268 = vmatprep.subr.bf16.mxu1 %v1267_v6 }
  0x40   :  { %1270 = vmatpush3.bf16.msra.mxu1 %v1267_v6 }
  0x42   :  { %471 = vmatmul.mubr.bf16.gmra.mrb[16].mxu0 %v1317_v54 }
  0x43   :  { %478 = vmatprep.mubr.bf16.mxu0 %v1318_v55 }
  0x4a   :  { %479 = vmatmul.mubr.bf16.gmra.mrb[20].mxu0 %v1320_v56 }
  0x4b   :  { %486 = vmatprep.mubr.bf16.mxu0 %v1321_v57 }
  0x52   :  { %487 = vmatmul.mubr.bf16.gmra.mrb[24].mxu0 %v1323_v58 }
  0x53   :  { %494 = vmatprep.mubr.bf16.mxu0 %v1324_v59 }
  0x5a   :  { %495 = vmatmul.mubr.bf16.gmra.mrb[28].mxu0 %v1326_v60 }
  0x5b   :  { %502 = vmatprep.mubr.bf16.mxu0 %v1327_v61 }
  0x62   :  { %503 = vmatmul.mubr.bf16.gmra.mrb[32].mxu0 %v1329_v62 }
  0x63   :  { %510 = vmatprep.mubr.bf16.mxu0 %v1330_v63 }
  0x6a   :  { %511 = vmatmul.mubr.bf16.gmra.mrb[36].mxu0 %v1332_v0 }
  0x6b   :  { %518 = vmatprep.mubr.bf16.mxu0 %v1336_v1 }
  0x72   :  { %519 = vmatmul.mubr.bf16.gmra.mrb[40].mxu0 %v1338_v2 }
  0x73   :  { %526 = vmatprep.mubr.bf16.mxu0 %v1342_v3 }
  0x7a   :  { %527 = vmatmul.mubr.bf16.gmra.mrb[44].mxu0 %v1344_v7 }
  0xf5   :  { %v1015_v8 = vpop.f32.mrb[0].mxu0  ;;  %v1087_v10 = vpop.f32.mrb[0].mxu1 }
  0xf6   :  { %v1016_v9 = vpop.f32.mrb[1].mxu0  ;;  %v1088_v13 = vpop.f32.mrb[1].mxu1 }
  0xf7   :  { %v1017_v11 = vadd.f32 %v1016_v9, %v1015_v8  ;;  %v1018_v12 = vpop.f32.mrb[2].mxu0  ;;  %v1568_v15 = vadd.f32 %v1088_v13, %v1087_v10  ;;  %v1090_v16 = vpop.f32.mrb[2].mxu1 }
  0xf8   :  { %v1019_v14 = vpop.f32.mrb[3].mxu0  ;;  %v1091_v18 = vpop.f32.mrb[3].mxu1 }
  0xf9   :  { %v1020_v17 = vadd.f32 %v1019_v14, %v1018_v12  ;;  %1191 = vmatprep.mubr.f32.mxu1 %v1017_v11  ;;  %v1570_v19 = vadd.f32 %v1091_v18, %v1090_v16 }
  0xfb   :  { %1192 = vmatmul.mubr.f32.vlgmr.msra.gmra.mrb[16].mxu1 %v1020_v17 }
  0xfd   :  { %v1021_v20 = vpop.f32.mrb[4].mxu0  ;;  %v1093_v22 = vpop.f32.mrb[4].mxu1 }
  0xfe   :  { %v1022_v21 = vpop.f32.mrb[5].mxu0  ;;  %v1094_v25 = vpop.f32.mrb[5].mxu1 }
  0xff   :  { %v1023_v23 = vadd.f32 %v1022_v21, %v1021_v20  ;;  %v1024_v24 = vpop.f32.mrb[6].mxu0  ;;  %v1572_v27 = vadd.f32 %v1094_v25, %v1093_v22  ;;  %v1096_v28 = vpop.f32.mrb[6].mxu1 }
 0x100   :  { %v1025_v26 = vpop.f32.mrb[7].mxu0  ;;  %v1097_v30 = vpop.f32.mrb[7].mxu1 }
 0x101   :  { %v1026_v29 = vadd.f32 %v1025_v26, %v1024_v24  ;;  %1194 = vmatprep.mubr.f32.mxu1 %v1023_v23  ;;  %v1574_v31 = vadd.f32 %v1097_v30, %v1096_v28 }
 0x103   :  { %1195 = vmatmul.mubr.f32.gmra.mrb[18].mxu1 %v1026_v29 }
 0x105   :  { %v1027_v32 = vpop.f32.mrb[8].mxu0  ;;  %v1099_v34 = vpop.f32.mrb[8].mxu1 }
 0x106   :  { %v1028_v33 = vpop.f32.mrb[9].mxu0  ;;  %v1100_v37 = vpop.f32.mrb[9].mxu1 }
 0x107   :  { %v1029_v35 = vadd.f32 %v1028_v33, %v1027_v32  ;;  %v1030_v36 = vpop.f32.mrb[10].mxu0  ;;  %v1576_v39 = vadd.f32 %v1100_v37, %v1099_v34  ;;  %v1102_v40 = vpop.f32.mrb[10].mxu1 }
 0x108   :  { %v1031_v38 = vpop.f32.mrb[11].mxu0  ;;  %v1103_v42 = vpop.f32.mrb[11].mxu1 }
 0x109   :  { %v1032_v41 = vadd.f32 %v1031_v38, %v1030_v36  ;;  %1197 = vmatprep.mubr.f32.mxu1 %v1029_v35  ;;  %v1578_v43 = vadd.f32 %v1103_v42, %v1102_v40 }
 0x10b   :  { %1198 = vmatmul.mubr.f32.gmra.mrb[20].mxu1 %v1032_v41 }
 0x10d   :  { %v1033_v44 = vpop.f32.mrb[12].mxu0  ;;  %v1105_v46 = vpop.f32.mrb[12].mxu1 }
 0x10e   :  { %v1034_v45 = vpop.f32.mrb[13].mxu0  ;;  %v1106_v49 = vpop.f32.mrb[13].mxu1 }
 0x10f   :  { %v1035_v47 = vadd.f32 %v1034_v45, %v1033_v44  ;;  %v1036_v48 = vpop.f32.mrb[14].mxu0  ;;  %v1580_v51 = vadd.f32 %v1106_v49, %v1105_v46  ;;  %v1108_v52 = vpop.f32.mrb[14].mxu1  ;;  %v1595_v46 = vld [vmem:[%s1728_s3] ss:$0 sm:$0xff] }
 0x110   :  { %v1037_v50 = vpop.f32.mrb[15].mxu0  ;;  %v1109_v54 = vpop.f32.mrb[15].mxu1 }
 0x111   :  { %v1038_v53 = vadd.f32 %v1037_v50, %v1036_v48  ;;  %1200 = vmatprep.mubr.f32.mxu1 %v1035_v47  ;;  %v1582_v55 = vadd.f32 %v1109_v54, %v1108_v52 }
 0x113   :  { %1201 = vmatmul.mubr.f32.gmra.mrb[22].mxu1 %v1038_v53 }
 0x115   :  { %v1039_v56 = vpop.f32.mrb[16].mxu0 }
 0x116   :  { %v1040_v57 = vpop.f32.mrb[17].mxu0 }
 0x117   :  { %v1041_v58 = vadd.f32 %v1040_v57, %v1039_v56  ;;  %v1042_v59 = vpop.f32.mrb[18].mxu0 }
 0x118   :  { %v1043_v60 = vpop.f32.mrb[19].mxu0 }
 0x119   :  { %v1044_v61 = vadd.f32 %v1043_v60, %v1042_v59  ;;  %1203 = vmatprep.mubr.f32.mxu1 %v1041_v58 }
 0x11b   :  { %1204 = vmatmul.mubr.f32.gmra.mrb[24].mxu1 %v1044_v61 }
 0x11d   :  { %v1045_v62 = vpop.f32.mrb[20].mxu0 }
 0x11e   :  { %v1046_v63 = vpop.f32.mrb[21].mxu0 }
 0x11f   :  { %v1047_v0 = vadd.f32 %v1046_v63, %v1045_v62  ;;  %v1048_v1 = vpop.f32.mrb[22].mxu0 }
 0x120   :  { %v1049_v2 = vpop.f32.mrb[23].mxu0 }
 0x121   :  { %v1050_v3 = vadd.f32 %v1049_v2, %v1048_v1  ;;  %1206 = vmatprep.mubr.f32.mxu1 %v1047_v0 }
 0x123   :  { %1207 = vmatmul.mubr.f32.gmra.mrb[26].mxu1 %v1050_v3 }
 0x125   :  { %v1051_v4 = vpop.f32.mrb[24].mxu0 }
 0x126   :  { %v1052_v5 = vpop.f32.mrb[25].mxu0 }
 0x127   :  { %v1053_v6 = vadd.f32 %v1052_v5, %v1051_v4  ;;  %v1054_v7 = vpop.f32.mrb[26].mxu0 }
 0x128   :  { %v1055_v8 = vpop.f32.mrb[27].mxu0 }
 0x129   :  { %v1056_v9 = vadd.f32 %v1055_v8, %v1054_v7  ;;  %1209 = vmatprep.mubr.f32.mxu1 %v1053_v6 }
 0x12b   :  { %1210 = vmatmul.mubr.f32.gmra.mrb[28].mxu1 %v1056_v9 }
 0x12d   :  { %v1057_v10 = vpop.f32.mrb[28].mxu0 }
 0x12e   :  { %v1058_v11 = vpop.f32.mrb[29].mxu0 }
 0x12f   :  { %v1059_v12 = vadd.f32 %v1058_v11, %v1057_v10  ;;  %v1060_v13 = vpop.f32.mrb[30].mxu0 }
 0x130   :  { %v1061_v14 = vpop.f32.mrb[31].mxu0 }
 0x131   :  { %v1062_v16 = vadd.f32 %v1061_v14, %v1060_v13  ;;  %1212 = vmatprep.mubr.f32.mxu1 %v1059_v12 }
 0x133   :  { %1213 = vmatmul.mubr.f32.gmra.mrb[30].mxu1 %v1062_v16 }
 0x135   :  { %v1063_v17 = vpop.f32.mrb[32].mxu0 }
 0x136   :  { %v1064_v18 = vpop.f32.mrb[33].mxu0 }
 0x137   :  { %v1065_v20 = vadd.f32 %v1064_v18, %v1063_v17  ;;  %v1066_v21 = vpop.f32.mrb[34].mxu0 }
 0x138   :  { %v1067_v22 = vpop.f32.mrb[35].mxu0 }
 0x139   :  { %v1068_v23 = vadd.f32 %v1067_v22, %v1066_v21  ;;  %1215 = vmatprep.mubr.f32.mxu1 %v1065_v20 }
 0x13b   :  { %1216 = vmatmul.mubr.f32.gmra.mrb[32].mxu1 %v1068_v23 }
 0x13d   :  { %v1069_v24 = vpop.f32.mrb[36].mxu0 }
 0x13e   :  { %v1070_v25 = vpop.f32.mrb[37].mxu0 }
 0x13f   :  { %v1071_v26 = vadd.f32 %v1070_v25, %v1069_v24  ;;  %v1072_v28 = vpop.f32.mrb[38].mxu0 }
 0x140   :  { %v1073_v29 = vpop.f32.mrb[39].mxu0 }
 0x141   :  { %v1074_v30 = vadd.f32 %v1073_v29, %v1072_v28  ;;  %1218 = vmatprep.mubr.f32.mxu1 %v1071_v26 }
 0x143   :  { %1219 = vmatmul.mubr.f32.gmra.mrb[34].mxu1 %v1074_v30 }
 0x145   :  { %v1075_v32 = vpop.f32.mrb[40].mxu0 }
 0x146   :  { %v1076_v33 = vpop.f32.mrb[41].mxu0 }
 0x147   :  { %v1077_v34 = vadd.f32 %v1076_v33, %v1075_v32  ;;  %v1078_v35 = vpop.f32.mrb[42].mxu0 }
 0x148   :  { %v1079_v36 = vpop.f32.mrb[43].mxu0 }
 0x149   :  { %v1080_v37 = vadd.f32 %v1079_v36, %v1078_v35  ;;  %1221 = vmatprep.mubr.f32.mxu1 %v1077_v34 }
 0x14b   :  { %1222 = vmatmul.mubr.f32.gmra.mrb[36].mxu1 %v1080_v37 }
 0x14d   :  { %v1081_v38 = vpop.f32.mrb[44].mxu0 }
 0x14e   :  { %v1082_v40 = vpop.f32.mrb[45].mxu0 }
 0x14f   :  { %v1083_v41 = vadd.f32 %v1082_v40, %v1081_v38  ;;  %v1084_v42 = vpop.f32.mrb[46].mxu0 }
 0x150   :  { %v1085_v44 = vpop.f32.mrb[47].mxu0 }
 0x151   :  { %v1086_v45 = vadd.f32 %v1085_v44, %v1084_v42  ;;  %1224 = vmatprep.mubr.f32.mxu1 %v1083_v41 }
 0x153   :  { %1225 = vmatmul.mubr.f32.gmra.mrb[38].mxu1 %v1086_v45 }
 0x154   :  { %1227 = vmatprep.mubr.f32.mxu1 %v1568_v15 }
 0x157   :  { %1228 = vmatmul.mubr.f32.gmra.mrb[40].mxu1 %v1570_v19 }
 0x158   :  { %1230 = vmatprep.mubr.f32.mxu1 %v1572_v27 }
 0x15b   :  { %1231 = vmatmul.mubr.f32.gmra.mrb[42].mxu1 %v1574_v31 }
 0x15c   :  { %1233 = vmatprep.mubr.f32.mxu1 %v1576_v39 }
 0x15f   :  { %1234 = vmatmul.mubr.f32.gmra.mrb[44].mxu1 %v1578_v43 }
 0x160   :  { %1236 = vmatprep.mubr.f32.mxu1 %v1580_v51 }
 0x163   :  { %1237 = vmatmul.mubr.f32.gmra.mrb[46].mxu1 %v1582_v55 }
 0x1ce   :  { %v1193_v15 = vpop.f32.mrb[16].mxu1 }
 0x1cf   :  { %v761_v19 = vadd.f32 %v1193_v15, %v1595_v46  ;;  %v755_v47 = vpop.f32.mrb[17].mxu1 }
 0x1d0   :  { %v756_v27 = vadd.f32 %v1595_v46, %v755_v47 }
 0x1d1   :  { %915 = vst [vmem:[%s1729_s4 + $0x8] sm:$0xff] %v761_v19 }
 0x1d2   :  { %914 = vst [vmem:[%s1729_s4] sm:$0xff] %v756_v27 }
 0x1d6   :  { %v1196_v31 = vpop.f32.mrb[18].mxu1 }
 0x1d7   :  { %v771_v39 = vadd.f32 %v1196_v31, %v1595_v46  ;;  %v765_v43 = vpop.f32.mrb[19].mxu1 }
 0x1d8   :  { %v766_v48 = vadd.f32 %v1595_v46, %v765_v43 }
 0x1d9   :  { %917 = vst [vmem:[%s1729_s4 + $0x18] sm:$0xff] %v771_v39 }
 0x1da   :  { %916 = vst [vmem:[%s1729_s4 + $0x10] sm:$0xff] %v766_v48 }
 0x1de   :  { %v1199_v49 = vpop.f32.mrb[20].mxu1 }
 0x1df   :  { %v781_v50 = vadd.f32 %v1199_v49, %v1595_v46  ;;  %v775_v51 = vpop.f32.mrb[21].mxu1 }
 0x1e0   :  { %v776_v52 = vadd.f32 %v1595_v46, %v775_v51 }
 0x1e1   :  { %919 = vst [vmem:[%s1729_s4 + $0x28] sm:$0xff] %v781_v50 }
 0x1e2   :  { %918 = vst [vmem:[%s1729_s4 + $0x20] sm:$0xff] %v776_v52 }
 0x1e6   :  { %v1202_v53 = vpop.f32.mrb[22].mxu1 }
 0x1e7   :  { %v791_v54 = vadd.f32 %v1202_v53, %v1595_v46  ;;  %v785_v55 = vpop.f32.mrb[23].mxu1 }
 0x1e8   :  { %v786_v56 = vadd.f32 %v1595_v46, %v785_v55 }
 0x1e9   :  { %921 = vst [vmem:[%s1729_s4 + $0x38] sm:$0xff] %v791_v54 }
 0x1ea   :  { %920 = vst [vmem:[%s1729_s4 + $0x30] sm:$0xff] %v786_v56 }
 0x1ee   :  { %v1205_v57 = vpop.f32.mrb[24].mxu1 }
 0x1ef   :  { %v801_v58 = vadd.f32 %v1205_v57, %v1595_v46  ;;  %v795_v59 = vpop.f32.mrb[25].mxu1 }
 0x1f0   :  { %v796_v60 = vadd.f32 %v1595_v46, %v795_v59 }
 0x1f1   :  { %923 = vst [vmem:[%s1729_s4 + $0x48] sm:$0xff] %v801_v58 }
 0x1f2   :  { %922 = vst [vmem:[%s1729_s4 + $0x40] sm:$0xff] %v796_v60 }
 0x1f6   :  { %v1208_v61 = vpop.f32.mrb[26].mxu1 }
 0x1f7   :  { %v811_v62 = vadd.f32 %v1208_v61, %v1595_v46  ;;  %v805_v63 = vpop.f32.mrb[27].mxu1 }
 0x1f8   :  { %v806_v0 = vadd.f32 %v1595_v46, %v805_v63 }
 0x1f9   :  { %925 = vst [vmem:[%s1729_s4 + $0x58] sm:$0xff] %v811_v62 }
 0x1fa   :  { %924 = vst [vmem:[%s1729_s4 + $0x50] sm:$0xff] %v806_v0 }
 0x1fe   :  { %v1211_v1 = vpop.f32.mrb[28].mxu1 }
 0x1ff   :  { %v821_v2 = vadd.f32 %v1211_v1, %v1595_v46  ;;  %v815_v3 = vpop.f32.mrb[29].mxu1 }
 0x200   :  { %v816_v4 = vadd.f32 %v1595_v46, %v815_v3 }
 0x201   :  { %927 = vst [vmem:[%s1729_s4 + $0x68] sm:$0xff] %v821_v2 }
 0x202   :  { %926 = vst [vmem:[%s1729_s4 + $0x60] sm:$0xff] %v816_v4 }
 0x206   :  { %v1214_v5 = vpop.f32.mrb[30].mxu1 }
 0x207   :  { %v831_v6 = vadd.f32 %v1214_v5, %v1595_v46  ;;  %v825_v7 = vpop.f32.mrb[31].mxu1 }
 0x208   :  { %v826_v8 = vadd.f32 %v1595_v46, %v825_v7 }
 0x209   :  { %929 = vst [vmem:[%s1729_s4 + $0x78] sm:$0xff] %v831_v6 }
 0x20a   :  { %928 = vst [vmem:[%s1729_s4 + $0x70] sm:$0xff] %v826_v8 }
 0x20e   :  { %v1217_v9 = vpop.f32.mrb[32].mxu1 }
 0x20f   :  { %v841_v10 = vadd.f32 %v1217_v9, %v1595_v46  ;;  %v835_v11 = vpop.f32.mrb[33].mxu1 }
 0x210   :  { %v836_v12 = vadd.f32 %v1595_v46, %v835_v11 }
 0x211   :  { %931 = vst [vmem:[%s1729_s4 + $0x88] sm:$0xff] %v841_v10 }
 0x212   :  { %930 = vst [vmem:[%s1729_s4 + $0x80] sm:$0xff] %v836_v12 }
 0x216   :  { %v1220_v13 = vpop.f32.mrb[34].mxu1 }
 0x217   :  { %v851_v14 = vadd.f32 %v1220_v13, %v1595_v46  ;;  %v845_v16 = vpop.f32.mrb[35].mxu1 }
 0x218   :  { %v846_v17 = vadd.f32 %v1595_v46, %v845_v16 }
 0x219   :  { %933 = vst [vmem:[%s1729_s4 + $0x98] sm:$0xff] %v851_v14 }
 0x21a   :  { %932 = vst [vmem:[%s1729_s4 + $0x90] sm:$0xff] %v846_v17 }
 0x21e   :  { %v1223_v18 = vpop.f32.mrb[36].mxu1 }
 0x21f   :  { %v861_v20 = vadd.f32 %v1223_v18, %v1595_v46  ;;  %v855_v21 = vpop.f32.mrb[37].mxu1 }
 0x220   :  { %v856_v22 = vadd.f32 %v1595_v46, %v855_v21 }
 0x221   :  { %935 = vst [vmem:[%s1729_s4 + $0xa8] sm:$0xff] %v861_v20 }
 0x222   :  { %934 = vst [vmem:[%s1729_s4 + $0xa0] sm:$0xff] %v856_v22 }
 0x226   :  { %v1226_v23 = vpop.f32.mrb[38].mxu1 }
 0x227   :  { %v871_v24 = vadd.f32 %v1226_v23, %v1595_v46  ;;  %v865_v25 = vpop.f32.mrb[39].mxu1 }
 0x228   :  { %v866_v26 = vadd.f32 %v1595_v46, %v865_v25 }
 0x229   :  { %937 = vst [vmem:[%s1729_s4 + $0xb8] sm:$0xff] %v871_v24 }
 0x22a   :  { %936 = vst [vmem:[%s1729_s4 + $0xb0] sm:$0xff] %v866_v26  ;;  %v1229_v28 = vpop.f32.mrb[40].mxu1 }
 0x22b   :  { %v881_v29 = vadd.f32 %v1229_v28, %v1595_v46  ;;  %v875_v30 = vpop.f32.mrb[41].mxu1 }
 0x22c   :  { %v876_v32 = vadd.f32 %v1595_v46, %v875_v30 }
 0x22d   :  { %939 = vst [vmem:[%s1729_s4 + $0xc8] sm:$0xff] %v881_v29 }
 0x22e   :  { %938 = vst [vmem:[%s1729_s4 + $0xc0] sm:$0xff] %v876_v32  ;;  %v1232_v33 = vpop.f32.mrb[42].mxu1 }
 0x22f   :  { %v891_v34 = vadd.f32 %v1232_v33, %v1595_v46  ;;  %v885_v35 = vpop.f32.mrb[43].mxu1 }
 0x230   :  { %v886_v36 = vadd.f32 %v1595_v46, %v885_v35 }
 0x231   :  { %941 = vst [vmem:[%s1729_s4 + $0xd8] sm:$0xff] %v891_v34 }
 0x232   :  { %940 = vst [vmem:[%s1729_s4 + $0xd0] sm:$0xff] %v886_v36  ;;  %v1235_v37 = vpop.f32.mrb[44].mxu1 }
 0x233   :  { %v901_v38 = vadd.f32 %v1235_v37, %v1595_v46  ;;  %v895_v40 = vpop.f32.mrb[45].mxu1 }
 0x234   :  { %v896_v41 = vadd.f32 %v1595_v46, %v895_v40 }
 0x235   :  { %943 = vst [vmem:[%s1729_s4 + $0xe8] sm:$0xff] %v901_v38 }
 0x236   :  { %942 = vst [vmem:[%s1729_s4 + $0xe0] sm:$0xff] %v896_v41  ;;  %v1238_v42 = vpop.f32.mrb[46].mxu1 }
 0x237   :  { %v911_v44 = vadd.f32 %v1238_v42, %v1595_v46  ;;  %v905_v45 = vpop.f32.mrb[47].mxu1 }
 0x238   :  { %v906_v15 = vadd.f32 %v1595_v46, %v905_v45 }
 0x239   :  { %945 = vst [vmem:[%s1729_s4 + $0xf8] sm:$0xff] %v911_v44 }
 0x23a   :  { %944 = vst [vmem:[%s1729_s4 + $0xf0] sm:$0xff] %v906_v15 }

// kernel: gcn_encoder_forward.3
= control target key start
LH: loop header
LB: loop body
LE: loop exit
PB: predicated region body
PF: predicated region fallthrough
CT: control target
= control target key end

     0   :  { %s1996_s1 = inlined_call_operand.vmem [shape: bf16[256,128], index: 1, kind: input, shape index: {}]   ;;  %s1997_s0 = inlined_call_operand.vmem [shape: bf16[256,256], index: 0, kind: input, shape index: {}]   ;;  %s1998_s2 = inlined_call_operand.vmem [shape: f32[128,128], index: 2, kind: input, shape index: {}]   ;;  %s1999_s3 = inlined_call_operand.vmem [shape: f32[1,128], index: 3, kind: input, shape index: {}]   ;;  %s2000_s4 = inlined_call_operand.vmem [shape: bf16[256,128], index: 4, kind: output, shape index: {}]  }
   0x1   :  { %v1606_v0 = vld [vmem:[%s1996_s1 + $0x40] sm:$0xff]   ;;  %v1608_v2 = vld [vmem:[%s1996_s1 + $0x48] sm:$0xff]   ;;  %v1610_v4 = vld [vmem:[%s1996_s1 + $0x50] sm:$0xff]  }
   0x2   :  { %v1607_v1 = vld [vmem:[%s1996_s1] sm:$0xff]   ;;  %1318 = vmatprep.subr.bf16.mxu0 %v1606_v0  ;;  %1590 = vmatprep.subr.bf16.mxu1 %v1606_v0  ;;  %v1609_v3 = vld [vmem:[%s1996_s1 + $0x8] sm:$0xff]   ;;  %v1611_v5 = vld [vmem:[%s1996_s1 + $0x10] sm:$0xff]  }
   0x3   :  { %1319 = vmatpush3.bf16.msra.mxu0 %v1607_v1  ;;  %1598 = vmatpush3.bf16.msra.mxu1 %v1607_v1  ;;  %v1612_v6 = vld [vmem:[%s1996_s1 + $0x58] sm:$0xff]   ;;  %v1614_v8 = vld [vmem:[%s1996_s1 + $0x60] sm:$0xff]   ;;  %v1616_v10 = vld [vmem:[%s1996_s1 + $0x68] sm:$0xff]  }
   0x4   :  { %1320 = vmatprep.subr.bf16.mxu0 %v1608_v2  ;;  %1591 = vmatprep.subr.bf16.mxu1 %v1608_v2  ;;  %v1613_v7 = vld [vmem:[%s1996_s1 + $0x18] sm:$0xff]   ;;  %v1615_v9 = vld [vmem:[%s1996_s1 + $0x20] sm:$0xff]   ;;  %v1617_v12 = vld [vmem:[%s1996_s1 + $0x28] sm:$0xff]  }
   0x5   :  { %v1624_v11 = vld [vmem:[%s1997_s0 + $0x4] ss:$8 sps:$4 sm:$0xff]   ;;  %v1618_v13 = vld [vmem:[%s1996_s1 + $0x70] sm:$0xff]   ;;  %v1620_v15 = vld [vmem:[%s1996_s1 + $0x78] sm:$0xff]  }
   0x6   :  { %438 = vmatprep.mubr.bf16.mxu0 %v1624_v11  ;;  %v1619_v14 = vld [vmem:[%s1996_s1 + $0x30] sm:$0xff]   ;;  %v1621_v16 = vld [vmem:[%s1996_s1 + $0x38] sm:$0xff]   ;;  %v1622_v17 = vld [vmem:[%s1997_s0] ss:$8 sps:$4 sm:$0xff]  }
   0x7   :  { %1321 = vmatpush3.bf16.msra.mxu0 %v1609_v3  ;;  %1599 = vmatpush3.bf16.msra.mxu1 %v1609_v3  ;;  %v1654_v18 = vld [vmem:[%s1997_s0 + $0xc4] ss:$8 sps:$4 sm:$0xff]   ;;  %v1625_v19 = vld [vmem:[%s1997_s0 + $0x14] ss:$8 sps:$4 sm:$0xff]   ;;  %v1652_v20 = vld [vmem:[%s1997_s0 + $0xc0] ss:$8 sps:$4 sm:$0xff]  }
   0x8   :  { %1322 = vmatprep.subr.bf16.mxu0 %v1610_v4  ;;  %1592 = vmatprep.subr.bf16.mxu1 %v1610_v4  ;;  %v1658_v21 = vld [vmem:[%s1997_s0 + $0xd4] ss:$8 sps:$4 sm:$0xff]   ;;  %v1627_v22 = vld [vmem:[%s1997_s0 + $0x10] ss:$8 sps:$4 sm:$0xff]   ;;  %v666_v23 = vld [vmem:[%s1998_s2] sm:$0xff] }
   0x9   :  { %534 = vmatprep.mubr.bf16.mxu1 %v1654_v18  ;;  %v667_v24 = vld [vmem:[%s1998_s2 + $0x8] sm:$0xff]  ;;  %v668_v27 = vld [vmem:[%s1998_s2 + $0x10] sm:$0xff]  ;;  %v669_v28 = vld [vmem:[%s1998_s2 + $0x18] sm:$0xff] }
   0xa   :  { %v1628_v25 = vld [vmem:[%s1997_s0 + $0x24] ss:$8 sps:$4 sm:$0xff]   ;;  %v1558_v26 = vpack.c.bf16 %v667_v24, %v666_v23  ;;  %v1660_v29 = vld [vmem:[%s1997_s0 + $0xd0] ss:$8 sps:$4 sm:$0xff]   ;;  %v1562_v30 = vpack.c.bf16 %v669_v28, %v668_v27  ;;  %v1630_v37 = vld [vmem:[%s1997_s0 + $0x20] ss:$8 sps:$4 sm:$0xff]  }
   0xb   :  { %1323 = vmatpush3.bf16.msra.mxu0 %v1611_v5  ;;  %1600 = vmatpush3.bf16.msra.mxu1 %v1611_v5  ;;  %v670_v31 = vld [vmem:[%s1998_s2 + $0x20] sm:$0xff]  ;;  %v671_v32 = vld [vmem:[%s1998_s2 + $0x28] sm:$0xff]  ;;  %v672_v35 = vld [vmem:[%s1998_s2 + $0x30] sm:$0xff] }
   0xc   :  { %1324 = vmatprep.subr.bf16.mxu0 %v1612_v6  ;;  %1593 = vmatprep.subr.bf16.mxu1 %v1612_v6  ;;  %v1664_v33 = vld [vmem:[%s1997_s0 + $0xe4] ss:$8 sps:$4 sm:$0xff]   ;;  %v1566_v34 = vpack.c.bf16 %v671_v32, %v670_v31  ;;  %v673_v36 = vld [vmem:[%s1998_s2 + $0x38] sm:$0xff]  ;;  %v1666_v40 = vld [vmem:[%s1997_s0 + $0xe0] ss:$8 sps:$4 sm:$0xff]  }
   0xd   :  { %v1631_v38 = vld [vmem:[%s1997_s0 + $0x34] ss:$8 sps:$4 sm:$0xff]   ;;  %v1570_v39 = vpack.c.bf16 %v673_v36, %v672_v35  ;;  %v674_v41 = vld [vmem:[%s1998_s2 + $0x40] sm:$0xff]  ;;  %v675_v42 = vld [vmem:[%s1998_s2 + $0x48] sm:$0xff] }
   0xe   :  { %v1667_v43 = vld [vmem:[%s1997_s0 + $0xf4] ss:$8 sps:$4 sm:$0xff]   ;;  %v1574_v44 = vpack.c.bf16 %v675_v42, %v674_v41  ;;  %v1633_v47 = vld [vmem:[%s1997_s0 + $0x30] ss:$8 sps:$4 sm:$0xff]   ;;  %v1634_v48 = vld [vmem:[%s1997_s0 + $0x44] ss:$8 sps:$4 sm:$0xff]  }
   0xf   :  { %1325 = vmatpush3.bf16.msra.mxu0 %v1613_v7  ;;  %1601 = vmatpush3.bf16.msra.mxu1 %v1613_v7  ;;  %v676_v45 = vld [vmem:[%s1998_s2 + $0x50] sm:$0xff]  ;;  %v677_v46 = vld [vmem:[%s1998_s2 + $0x58] sm:$0xff]  ;;  %v678_v51 = vld [vmem:[%s1998_s2 + $0x60] sm:$0xff] }
  0x10   :  { %1326 = vmatprep.subr.bf16.mxu0 %v1614_v8  ;;  %1594 = vmatprep.subr.bf16.mxu1 %v1614_v8  ;;  %v1578_v49 = vpack.c.bf16 %v677_v46, %v676_v45  ;;  %v1669_v50 = vld [vmem:[%s1997_s0 + $0xf0] ss:$8 sps:$4 sm:$0xff]   ;;  %v679_v52 = vld [vmem:[%s1998_s2 + $0x68] sm:$0xff]  ;;  %v1637_v55 = vld [vmem:[%s1997_s0 + $0x54] ss:$8 sps:$4 sm:$0xff]  }
  0x11   :  { %v1582_v53 = vpack.c.bf16 %v679_v52, %v678_v51  ;;  %v1636_v54 = vld [vmem:[%s1997_s0 + $0x40] ss:$8 sps:$4 sm:$0xff]   ;;  %v1639_v56 = vld [vmem:[%s1997_s0 + $0x50] ss:$8 sps:$4 sm:$0xff]   ;;  %v1640_v57 = vld [vmem:[%s1997_s0 + $0x64] ss:$8 sps:$4 sm:$0xff]  }
  0x12   :  { %v1642_v58 = vld [vmem:[%s1997_s0 + $0x60] ss:$8 sps:$4 sm:$0xff]   ;;  %v1643_v59 = vld [vmem:[%s1997_s0 + $0x74] ss:$8 sps:$4 sm:$0xff]   ;;  %v1645_v60 = vld [vmem:[%s1997_s0 + $0x70] ss:$8 sps:$4 sm:$0xff]  }
  0x13   :  { %1327 = vmatpush3.bf16.msra.mxu0 %v1615_v9  ;;  %1602 = vmatpush3.bf16.msra.mxu1 %v1615_v9  ;;  %v1646_v61 = vld [vmem:[%s1997_s0 + $0x84] ss:$8 sps:$4 sm:$0xff]   ;;  %v1648_v62 = vld [vmem:[%s1997_s0 + $0x80] ss:$8 sps:$4 sm:$0xff]   ;;  %v1649_v63 = vld [vmem:[%s1997_s0 + $0x94] ss:$8 sps:$4 sm:$0xff]  }
  0x14   :  { %1328 = vmatprep.subr.bf16.mxu0 %v1616_v10  ;;  %1595 = vmatprep.subr.bf16.mxu1 %v1616_v10  ;;  %v1651_v0 = vld [vmem:[%s1997_s0 + $0x90] ss:$8 sps:$4 sm:$0xff]   ;;  %v1655_v1 = vld [vmem:[%s1997_s0 + $0xa4] ss:$8 sps:$4 sm:$0xff]   ;;  %v1657_v2 = vld [vmem:[%s1997_s0 + $0xa0] ss:$8 sps:$4 sm:$0xff]  }
  0x15   :  { %v1661_v3 = vld [vmem:[%s1997_s0 + $0xb4] ss:$8 sps:$4 sm:$0xff]   ;;  %v1663_v7 = vld [vmem:[%s1997_s0 + $0xb0] ss:$8 sps:$4 sm:$0xff]  }
  0x16   :  { %v680_v4 = vld [vmem:[%s1998_s2 + $0x70] sm:$0xff]  ;;  %v681_v5 = vld [vmem:[%s1998_s2 + $0x78] sm:$0xff] }
  0x17   :  { %1329 = vmatpush3.bf16.msra.mxu0 %v1617_v12  ;;  %1603 = vmatpush3.bf16.msra.mxu1 %v1617_v12  ;;  %v1586_v6 = vpack.c.bf16 %v681_v5, %v680_v4 }
  0x18   :  { %1330 = vmatprep.subr.bf16.mxu0 %v1618_v13  ;;  %1596 = vmatprep.subr.bf16.mxu1 %v1618_v13 }
  0x1b   :  { %1331 = vmatpush3.bf16.msra.mxu0 %v1619_v14  ;;  %1604 = vmatpush3.bf16.msra.mxu1 %v1619_v14 }
  0x1c   :  { %1332 = vmatprep.subr.bf16.mxu0 %v1620_v15  ;;  %1597 = vmatprep.subr.bf16.mxu1 %v1620_v15 }
  0x1f   :  { %1333 = vmatpush3.bf16.msra.mxu0 %v1621_v16  ;;  %1605 = vmatpush3.bf16.msra.mxu1 %v1621_v16 }
  0x20   :  { %1559 = vmatprep.subr.bf16.mxu1 %v1558_v26 }
  0x22   :  { %439 = vmatmul.mubr.bf16.vlgmr.msra.gmra.mrb[0].mxu0 %v1622_v17  ;;  %535 = vmatmul.mubr.bf16.vlgmr.msra.gmra.mrb[0].mxu1 %v1652_v20 }
  0x23   :  { %446 = vmatprep.mubr.bf16.mxu0 %v1625_v19  ;;  %542 = vmatprep.mubr.bf16.mxu1 %v1658_v21 }
  0x24   :  { %1561 = vmatpush3.bf16.msra.mxu1 %v1558_v26 }
  0x25   :  { %1563 = vmatprep.subr.bf16.mxu1 %v1562_v30 }
  0x28   :  { %1565 = vmatpush3.bf16.msra.mxu1 %v1562_v30 }
  0x29   :  { %1567 = vmatprep.subr.bf16.mxu1 %v1566_v34 }
  0x2a   :  { %447 = vmatmul.mubr.bf16.gmra.mrb[4].mxu0 %v1627_v22  ;;  %543 = vmatmul.mubr.bf16.gmra.mrb[4].mxu1 %v1660_v29 }
  0x2b   :  { %454 = vmatprep.mubr.bf16.mxu0 %v1628_v25  ;;  %550 = vmatprep.mubr.bf16.mxu1 %v1664_v33 }
  0x2c   :  { %1569 = vmatpush3.bf16.msra.mxu1 %v1566_v34 }
  0x2d   :  { %1571 = vmatprep.subr.bf16.mxu1 %v1570_v39 }
  0x30   :  { %1573 = vmatpush3.bf16.msra.mxu1 %v1570_v39 }
  0x31   :  { %1575 = vmatprep.subr.bf16.mxu1 %v1574_v44 }
  0x32   :  { %455 = vmatmul.mubr.bf16.gmra.mrb[8].mxu0 %v1630_v37  ;;  %551 = vmatmul.mubr.bf16.gmra.mrb[8].mxu1 %v1666_v40 }
  0x33   :  { %462 = vmatprep.mubr.bf16.mxu0 %v1631_v38  ;;  %558 = vmatprep.mubr.bf16.mxu1 %v1667_v43 }
  0x34   :  { %1577 = vmatpush3.bf16.msra.mxu1 %v1574_v44 }
  0x35   :  { %1579 = vmatprep.subr.bf16.mxu1 %v1578_v49 }
  0x38   :  { %1581 = vmatpush3.bf16.msra.mxu1 %v1578_v49 }
  0x39   :  { %1583 = vmatprep.subr.bf16.mxu1 %v1582_v53 }
  0x3a   :  { %463 = vmatmul.mubr.bf16.gmra.mrb[12].mxu0 %v1633_v47  ;;  %559 = vmatmul.mubr.bf16.gmra.mrb[12].mxu1 %v1669_v50 }
  0x3b   :  { %470 = vmatprep.mubr.bf16.mxu0 %v1634_v48 }
  0x3c   :  { %1585 = vmatpush3.bf16.msra.mxu1 %v1582_v53 }
  0x3d   :  { %1587 = vmatprep.subr.bf16.mxu1 %v1586_v6 }
  0x40   :  { %1589 = vmatpush3.bf16.msra.mxu1 %v1586_v6 }
  0x42   :  { %471 = vmatmul.mubr.bf16.gmra.mrb[16].mxu0 %v1636_v54 }
  0x43   :  { %478 = vmatprep.mubr.bf16.mxu0 %v1637_v55 }
  0x4a   :  { %479 = vmatmul.mubr.bf16.gmra.mrb[20].mxu0 %v1639_v56 }
  0x4b   :  { %486 = vmatprep.mubr.bf16.mxu0 %v1640_v57 }
  0x52   :  { %487 = vmatmul.mubr.bf16.gmra.mrb[24].mxu0 %v1642_v58 }
  0x53   :  { %494 = vmatprep.mubr.bf16.mxu0 %v1643_v59 }
  0x5a   :  { %495 = vmatmul.mubr.bf16.gmra.mrb[28].mxu0 %v1645_v60 }
  0x5b   :  { %502 = vmatprep.mubr.bf16.mxu0 %v1646_v61 }
  0x62   :  { %503 = vmatmul.mubr.bf16.gmra.mrb[32].mxu0 %v1648_v62 }
  0x63   :  { %510 = vmatprep.mubr.bf16.mxu0 %v1649_v63 }
  0x6a   :  { %511 = vmatmul.mubr.bf16.gmra.mrb[36].mxu0 %v1651_v0 }
  0x6b   :  { %518 = vmatprep.mubr.bf16.mxu0 %v1655_v1 }
  0x72   :  { %519 = vmatmul.mubr.bf16.gmra.mrb[40].mxu0 %v1657_v2 }
  0x73   :  { %526 = vmatprep.mubr.bf16.mxu0 %v1661_v3 }
  0x7a   :  { %527 = vmatmul.mubr.bf16.gmra.mrb[44].mxu0 %v1663_v7 }
  0xf5   :  { %v1334_v8 = vpop.f32.mrb[0].mxu0  ;;  %v1406_v10 = vpop.f32.mrb[0].mxu1 }
  0xf6   :  { %v1335_v9 = vpop.f32.mrb[1].mxu0  ;;  %v1407_v13 = vpop.f32.mrb[1].mxu1 }
  0xf7   :  { %v1336_v11 = vadd.f32 %v1335_v9, %v1334_v8  ;;  %v1337_v12 = vpop.f32.mrb[2].mxu0  ;;  %v1887_v15 = vadd.f32 %v1407_v13, %v1406_v10  ;;  %v1409_v16 = vpop.f32.mrb[2].mxu1 }
  0xf8   :  { %v1338_v14 = vpop.f32.mrb[3].mxu0  ;;  %v1410_v18 = vpop.f32.mrb[3].mxu1 }
  0xf9   :  { %v1339_v17 = vadd.f32 %v1338_v14, %v1337_v12  ;;  %1510 = vmatprep.mubr.f32.mxu1 %v1336_v11  ;;  %v1889_v19 = vadd.f32 %v1410_v18, %v1409_v16 }
  0xfb   :  { %1511 = vmatmul.mubr.f32.vlgmr.msra.gmra.mrb[16].mxu1 %v1339_v17 }
  0xfd   :  { %v1340_v20 = vpop.f32.mrb[4].mxu0  ;;  %v1412_v22 = vpop.f32.mrb[4].mxu1 }
  0xfe   :  { %v1341_v21 = vpop.f32.mrb[5].mxu0  ;;  %v1413_v25 = vpop.f32.mrb[5].mxu1 }
  0xff   :  { %v1342_v23 = vadd.f32 %v1341_v21, %v1340_v20  ;;  %v1343_v24 = vpop.f32.mrb[6].mxu0  ;;  %v1891_v27 = vadd.f32 %v1413_v25, %v1412_v22  ;;  %v1415_v28 = vpop.f32.mrb[6].mxu1 }
 0x100   :  { %v1344_v26 = vpop.f32.mrb[7].mxu0  ;;  %v1416_v30 = vpop.f32.mrb[7].mxu1 }
 0x101   :  { %v1345_v29 = vadd.f32 %v1344_v26, %v1343_v24  ;;  %1513 = vmatprep.mubr.f32.mxu1 %v1342_v23  ;;  %v1893_v31 = vadd.f32 %v1416_v30, %v1415_v28 }
 0x103   :  { %1514 = vmatmul.mubr.f32.gmra.mrb[18].mxu1 %v1345_v29 }
 0x105   :  { %v1346_v32 = vpop.f32.mrb[8].mxu0  ;;  %v1418_v34 = vpop.f32.mrb[8].mxu1 }
 0x106   :  { %v1347_v33 = vpop.f32.mrb[9].mxu0  ;;  %v1419_v37 = vpop.f32.mrb[9].mxu1 }
 0x107   :  { %v1348_v35 = vadd.f32 %v1347_v33, %v1346_v32  ;;  %v1349_v36 = vpop.f32.mrb[10].mxu0  ;;  %v1895_v39 = vadd.f32 %v1419_v37, %v1418_v34  ;;  %v1421_v40 = vpop.f32.mrb[10].mxu1 }
 0x108   :  { %v1350_v38 = vpop.f32.mrb[11].mxu0  ;;  %v1422_v42 = vpop.f32.mrb[11].mxu1 }
 0x109   :  { %v1351_v41 = vadd.f32 %v1350_v38, %v1349_v36  ;;  %1516 = vmatprep.mubr.f32.mxu1 %v1348_v35  ;;  %v1897_v43 = vadd.f32 %v1422_v42, %v1421_v40 }
 0x10b   :  { %1517 = vmatmul.mubr.f32.gmra.mrb[20].mxu1 %v1351_v41 }
 0x10d   :  { %v1352_v44 = vpop.f32.mrb[12].mxu0  ;;  %v1424_v46 = vpop.f32.mrb[12].mxu1 }
 0x10e   :  { %v1353_v45 = vpop.f32.mrb[13].mxu0  ;;  %v1425_v49 = vpop.f32.mrb[13].mxu1 }
 0x10f   :  { %v1354_v47 = vadd.f32 %v1353_v45, %v1352_v44  ;;  %v1355_v48 = vpop.f32.mrb[14].mxu0  ;;  %v1899_v51 = vadd.f32 %v1425_v49, %v1424_v46  ;;  %v1427_v52 = vpop.f32.mrb[14].mxu1  ;;  %v1914_v46 = vld [vmem:[%s1999_s3] ss:$0 sm:$0xff] }
 0x110   :  { %v1356_v50 = vpop.f32.mrb[15].mxu0  ;;  %v1428_v54 = vpop.f32.mrb[15].mxu1 }
 0x111   :  { %v1357_v53 = vadd.f32 %v1356_v50, %v1355_v48  ;;  %1519 = vmatprep.mubr.f32.mxu1 %v1354_v47  ;;  %v1901_v55 = vadd.f32 %v1428_v54, %v1427_v52 }
 0x113   :  { %1520 = vmatmul.mubr.f32.gmra.mrb[22].mxu1 %v1357_v53 }
 0x115   :  { %v1358_v56 = vpop.f32.mrb[16].mxu0 }
 0x116   :  { %v1359_v57 = vpop.f32.mrb[17].mxu0 }
 0x117   :  { %v1360_v58 = vadd.f32 %v1359_v57, %v1358_v56  ;;  %v1361_v59 = vpop.f32.mrb[18].mxu0 }
 0x118   :  { %v1362_v60 = vpop.f32.mrb[19].mxu0 }
 0x119   :  { %v1363_v61 = vadd.f32 %v1362_v60, %v1361_v59  ;;  %1522 = vmatprep.mubr.f32.mxu1 %v1360_v58 }
 0x11b   :  { %1523 = vmatmul.mubr.f32.gmra.mrb[24].mxu1 %v1363_v61 }
 0x11d   :  { %v1364_v62 = vpop.f32.mrb[20].mxu0 }
 0x11e   :  { %v1365_v63 = vpop.f32.mrb[21].mxu0 }
 0x11f   :  { %v1366_v0 = vadd.f32 %v1365_v63, %v1364_v62  ;;  %v1367_v1 = vpop.f32.mrb[22].mxu0 }
 0x120   :  { %v1368_v2 = vpop.f32.mrb[23].mxu0 }
 0x121   :  { %v1369_v3 = vadd.f32 %v1368_v2, %v1367_v1  ;;  %1525 = vmatprep.mubr.f32.mxu1 %v1366_v0 }
 0x123   :  { %1526 = vmatmul.mubr.f32.gmra.mrb[26].mxu1 %v1369_v3 }
 0x125   :  { %v1370_v4 = vpop.f32.mrb[24].mxu0 }
 0x126   :  { %v1371_v5 = vpop.f32.mrb[25].mxu0 }
 0x127   :  { %v1372_v6 = vadd.f32 %v1371_v5, %v1370_v4  ;;  %v1373_v7 = vpop.f32.mrb[26].mxu0 }
 0x128   :  { %v1374_v8 = vpop.f32.mrb[27].mxu0 }
 0x129   :  { %v1375_v9 = vadd.f32 %v1374_v8, %v1373_v7  ;;  %1528 = vmatprep.mubr.f32.mxu1 %v1372_v6 }
 0x12b   :  { %1529 = vmatmul.mubr.f32.gmra.mrb[28].mxu1 %v1375_v9 }
 0x12d   :  { %v1376_v10 = vpop.f32.mrb[28].mxu0 }
 0x12e   :  { %v1377_v11 = vpop.f32.mrb[29].mxu0 }
 0x12f   :  { %v1378_v12 = vadd.f32 %v1377_v11, %v1376_v10  ;;  %v1379_v13 = vpop.f32.mrb[30].mxu0 }
 0x130   :  { %v1380_v14 = vpop.f32.mrb[31].mxu0 }
 0x131   :  { %v1381_v16 = vadd.f32 %v1380_v14, %v1379_v13  ;;  %1531 = vmatprep.mubr.f32.mxu1 %v1378_v12 }
 0x133   :  { %1532 = vmatmul.mubr.f32.gmra.mrb[30].mxu1 %v1381_v16 }
 0x135   :  { %v1382_v17 = vpop.f32.mrb[32].mxu0 }
 0x136   :  { %v1383_v18 = vpop.f32.mrb[33].mxu0 }
 0x137   :  { %v1384_v20 = vadd.f32 %v1383_v18, %v1382_v17  ;;  %v1385_v21 = vpop.f32.mrb[34].mxu0 }
 0x138   :  { %v1386_v22 = vpop.f32.mrb[35].mxu0 }
 0x139   :  { %v1387_v23 = vadd.f32 %v1386_v22, %v1385_v21  ;;  %1534 = vmatprep.mubr.f32.mxu1 %v1384_v20 }
 0x13b   :  { %1535 = vmatmul.mubr.f32.gmra.mrb[32].mxu1 %v1387_v23 }
 0x13d   :  { %v1388_v24 = vpop.f32.mrb[36].mxu0 }
 0x13e   :  { %v1389_v25 = vpop.f32.mrb[37].mxu0 }
 0x13f   :  { %v1390_v26 = vadd.f32 %v1389_v25, %v1388_v24  ;;  %v1391_v28 = vpop.f32.mrb[38].mxu0 }
 0x140   :  { %v1392_v29 = vpop.f32.mrb[39].mxu0 }
 0x141   :  { %v1393_v30 = vadd.f32 %v1392_v29, %v1391_v28  ;;  %1537 = vmatprep.mubr.f32.mxu1 %v1390_v26 }
 0x143   :  { %1538 = vmatmul.mubr.f32.gmra.mrb[34].mxu1 %v1393_v30 }
 0x145   :  { %v1394_v32 = vpop.f32.mrb[40].mxu0 }
 0x146   :  { %v1395_v33 = vpop.f32.mrb[41].mxu0 }
 0x147   :  { %v1396_v34 = vadd.f32 %v1395_v33, %v1394_v32  ;;  %v1397_v35 = vpop.f32.mrb[42].mxu0 }
 0x148   :  { %v1398_v36 = vpop.f32.mrb[43].mxu0 }
 0x149   :  { %v1399_v37 = vadd.f32 %v1398_v36, %v1397_v35  ;;  %1540 = vmatprep.mubr.f32.mxu1 %v1396_v34 }
 0x14b   :  { %1541 = vmatmul.mubr.f32.gmra.mrb[36].mxu1 %v1399_v37 }
 0x14d   :  { %v1400_v38 = vpop.f32.mrb[44].mxu0 }
 0x14e   :  { %v1401_v40 = vpop.f32.mrb[45].mxu0 }
 0x14f   :  { %v1402_v41 = vadd.f32 %v1401_v40, %v1400_v38  ;;  %v1403_v42 = vpop.f32.mrb[46].mxu0 }
 0x150   :  { %v1404_v44 = vpop.f32.mrb[47].mxu0 }
 0x151   :  { %v1405_v45 = vadd.f32 %v1404_v44, %v1403_v42  ;;  %1543 = vmatprep.mubr.f32.mxu1 %v1402_v41 }
 0x153   :  { %1544 = vmatmul.mubr.f32.gmra.mrb[38].mxu1 %v1405_v45 }
 0x154   :  { %1546 = vmatprep.mubr.f32.mxu1 %v1887_v15 }
 0x157   :  { %1547 = vmatmul.mubr.f32.gmra.mrb[40].mxu1 %v1889_v19 }
 0x158   :  { %1549 = vmatprep.mubr.f32.mxu1 %v1891_v27 }
 0x15b   :  { %1550 = vmatmul.mubr.f32.gmra.mrb[42].mxu1 %v1893_v31 }
 0x15c   :  { %1552 = vmatprep.mubr.f32.mxu1 %v1895_v39 }
 0x15f   :  { %1553 = vmatmul.mubr.f32.gmra.mrb[44].mxu1 %v1897_v43 }
 0x160   :  { %1555 = vmatprep.mubr.f32.mxu1 %v1899_v51 }
 0x163   :  { %1556 = vmatmul.mubr.f32.gmra.mrb[46].mxu1 %v1901_v55 }
 0x1ce   :  { %v1512_v15 = vpop.f32.mrb[16].mxu1 }
 0x1cf   :  { %v761_v19 = vadd.f32 %v1512_v15, %v1914_v46  ;;  %v755_v47 = vpop.f32.mrb[17].mxu1 }
 0x1d0   :  { %v756_v27 = vadd.f32 %v1914_v46, %v755_v47 }
 0x1d1   :  { %v915_v31 = vmax.f32 %v761_v19, 0.0 }
 0x1d2   :  { %v914_v48 = vmax.f32 %v756_v27, 0.0 }
 0x1d4   :  { %v1226_v39 = vpack.c.bf16 %v915_v31, %v914_v48 }
 0x1d6   :  { %1227 = vst [vmem:[%s2000_s4] sm:$0xff] %v1226_v39   ;;  %v1515_v43 = vpop.f32.mrb[18].mxu1 }
 0x1d7   :  { %v771_v49 = vadd.f32 %v1515_v43, %v1914_v46  ;;  %v765_v50 = vpop.f32.mrb[19].mxu1 }
 0x1d8   :  { %v766_v51 = vadd.f32 %v1914_v46, %v765_v50 }
 0x1d9   :  { %v917_v52 = vmax.f32 %v771_v49, 0.0 }
 0x1da   :  { %v916_v53 = vmax.f32 %v766_v51, 0.0 }
 0x1dc   :  { %v1231_v54 = vpack.c.bf16 %v917_v52, %v916_v53 }
 0x1de   :  { %1303 = vst [vmem:[%s2000_s4 + $0x8] sm:$0xff] %v1231_v54   ;;  %v1518_v55 = vpop.f32.mrb[20].mxu1 }
 0x1df   :  { %v781_v56 = vadd.f32 %v1518_v55, %v1914_v46  ;;  %v775_v57 = vpop.f32.mrb[21].mxu1 }
 0x1e0   :  { %v776_v58 = vadd.f32 %v1914_v46, %v775_v57 }
 0x1e1   :  { %v919_v59 = vmax.f32 %v781_v56, 0.0 }
 0x1e2   :  { %v918_v60 = vmax.f32 %v776_v58, 0.0 }
 0x1e4   :  { %v1236_v61 = vpack.c.bf16 %v919_v59, %v918_v60 }
 0x1e6   :  { %1304 = vst [vmem:[%s2000_s4 + $0x10] sm:$0xff] %v1236_v61   ;;  %v1521_v62 = vpop.f32.mrb[22].mxu1 }
 0x1e7   :  { %v791_v63 = vadd.f32 %v1521_v62, %v1914_v46  ;;  %v785_v0 = vpop.f32.mrb[23].mxu1 }
 0x1e8   :  { %v786_v1 = vadd.f32 %v1914_v46, %v785_v0 }
 0x1e9   :  { %v921_v2 = vmax.f32 %v791_v63, 0.0 }
 0x1ea   :  { %v920_v3 = vmax.f32 %v786_v1, 0.0 }
 0x1ec   :  { %v1241_v4 = vpack.c.bf16 %v921_v2, %v920_v3 }
 0x1ee   :  { %1305 = vst [vmem:[%s2000_s4 + $0x18] sm:$0xff] %v1241_v4   ;;  %v1524_v5 = vpop.f32.mrb[24].mxu1 }
 0x1ef   :  { %v801_v6 = vadd.f32 %v1524_v5, %v1914_v46  ;;  %v795_v7 = vpop.f32.mrb[25].mxu1 }
 0x1f0   :  { %v796_v8 = vadd.f32 %v1914_v46, %v795_v7 }
 0x1f1   :  { %v923_v9 = vmax.f32 %v801_v6, 0.0 }
 0x1f2   :  { %v922_v10 = vmax.f32 %v796_v8, 0.0 }
 0x1f4   :  { %v1246_v11 = vpack.c.bf16 %v923_v9, %v922_v10 }
 0x1f6   :  { %1306 = vst [vmem:[%s2000_s4 + $0x20] sm:$0xff] %v1246_v11   ;;  %v1527_v12 = vpop.f32.mrb[26].mxu1 }
 0x1f7   :  { %v811_v13 = vadd.f32 %v1527_v12, %v1914_v46  ;;  %v805_v14 = vpop.f32.mrb[27].mxu1 }
 0x1f8   :  { %v806_v16 = vadd.f32 %v1914_v46, %v805_v14 }
 0x1f9   :  { %v925_v17 = vmax.f32 %v811_v13, 0.0 }
 0x1fa   :  { %v924_v18 = vmax.f32 %v806_v16, 0.0 }
 0x1fc   :  { %v1251_v20 = vpack.c.bf16 %v925_v17, %v924_v18 }
 0x1fe   :  { %1307 = vst [vmem:[%s2000_s4 + $0x28] sm:$0xff] %v1251_v20   ;;  %v1530_v21 = vpop.f32.mrb[28].mxu1 }
 0x1ff   :  { %v821_v22 = vadd.f32 %v1530_v21, %v1914_v46  ;;  %v815_v23 = vpop.f32.mrb[29].mxu1 }
 0x200   :  { %v816_v24 = vadd.f32 %v1914_v46, %v815_v23 }
 0x201   :  { %v927_v25 = vmax.f32 %v821_v22, 0.0 }
 0x202   :  { %v926_v26 = vmax.f32 %v816_v24, 0.0 }
 0x204   :  { %v1256_v28 = vpack.c.bf16 %v927_v25, %v926_v26 }
 0x206   :  { %1308 = vst [vmem:[%s2000_s4 + $0x30] sm:$0xff] %v1256_v28   ;;  %v1533_v29 = vpop.f32.mrb[30].mxu1 }
 0x207   :  { %v831_v30 = vadd.f32 %v1533_v29, %v1914_v46  ;;  %v825_v32 = vpop.f32.mrb[31].mxu1 }
 0x208   :  { %v826_v33 = vadd.f32 %v1914_v46, %v825_v32 }
 0x209   :  { %v929_v34 = vmax.f32 %v831_v30, 0.0 }
 0x20a   :  { %v928_v35 = vmax.f32 %v826_v33, 0.0 }
 0x20c   :  { %v1261_v36 = vpack.c.bf16 %v929_v34, %v928_v35 }
 0x20e   :  { %1309 = vst [vmem:[%s2000_s4 + $0x38] sm:$0xff] %v1261_v36   ;;  %v1536_v37 = vpop.f32.mrb[32].mxu1 }
 0x20f   :  { %v841_v38 = vadd.f32 %v1536_v37, %v1914_v46  ;;  %v835_v40 = vpop.f32.mrb[33].mxu1 }
 0x210   :  { %v836_v41 = vadd.f32 %v1914_v46, %v835_v40 }
 0x211   :  { %v931_v42 = vmax.f32 %v841_v38, 0.0 }
 0x212   :  { %v930_v44 = vmax.f32 %v836_v41, 0.0 }
 0x214   :  { %v1266_v45 = vpack.c.bf16 %v931_v42, %v930_v44 }
 0x216   :  { %1310 = vst [vmem:[%s2000_s4 + $0x40] sm:$0xff] %v1266_v45   ;;  %v1539_v15 = vpop.f32.mrb[34].mxu1 }
 0x217   :  { %v851_v19 = vadd.f32 %v1539_v15, %v1914_v46  ;;  %v845_v47 = vpop.f32.mrb[35].mxu1 }
 0x218   :  { %v846_v27 = vadd.f32 %v1914_v46, %v845_v47 }
 0x219   :  { %v933_v31 = vmax.f32 %v851_v19, 0.0 }
 0x21a   :  { %v932_v48 = vmax.f32 %v846_v27, 0.0 }
 0x21c   :  { %v1271_v39 = vpack.c.bf16 %v933_v31, %v932_v48 }
 0x21e   :  { %1311 = vst [vmem:[%s2000_s4 + $0x48] sm:$0xff] %v1271_v39   ;;  %v1542_v43 = vpop.f32.mrb[36].mxu1 }
 0x21f   :  { %v861_v49 = vadd.f32 %v1542_v43, %v1914_v46  ;;  %v855_v50 = vpop.f32.mrb[37].mxu1 }
 0x220   :  { %v856_v51 = vadd.f32 %v1914_v46, %v855_v50 }
 0x221   :  { %v935_v52 = vmax.f32 %v861_v49, 0.0 }
 0x222   :  { %v934_v53 = vmax.f32 %v856_v51, 0.0 }
 0x224   :  { %v1276_v54 = vpack.c.bf16 %v935_v52, %v934_v53 }
 0x226   :  { %1312 = vst [vmem:[%s2000_s4 + $0x50] sm:$0xff] %v1276_v54   ;;  %v1545_v55 = vpop.f32.mrb[38].mxu1 }
 0x227   :  { %v871_v56 = vadd.f32 %v1545_v55, %v1914_v46  ;;  %v865_v57 = vpop.f32.mrb[39].mxu1 }
 0x228   :  { %v866_v58 = vadd.f32 %v1914_v46, %v865_v57 }
 0x229   :  { %v937_v59 = vmax.f32 %v871_v56, 0.0 }
 0x22a   :  { %v936_v60 = vmax.f32 %v866_v58, 0.0  ;;  %v1548_v61 = vpop.f32.mrb[40].mxu1 }
 0x22b   :  { %v881_v62 = vadd.f32 %v1548_v61, %v1914_v46  ;;  %v875_v63 = vpop.f32.mrb[41].mxu1 }
 0x22c   :  { %v1281_v0 = vpack.c.bf16 %v937_v59, %v936_v60  ;;  %v876_v1 = vadd.f32 %v1914_v46, %v875_v63 }
 0x22d   :  { %v939_v2 = vmax.f32 %v881_v62, 0.0 }
 0x22e   :  { %1313 = vst [vmem:[%s2000_s4 + $0x58] sm:$0xff] %v1281_v0   ;;  %v938_v3 = vmax.f32 %v876_v1, 0.0  ;;  %v1551_v4 = vpop.f32.mrb[42].mxu1 }
 0x22f   :  { %v891_v5 = vadd.f32 %v1551_v4, %v1914_v46  ;;  %v885_v6 = vpop.f32.mrb[43].mxu1 }
 0x230   :  { %v1286_v7 = vpack.c.bf16 %v939_v2, %v938_v3  ;;  %v886_v8 = vadd.f32 %v1914_v46, %v885_v6 }
 0x231   :  { %v941_v9 = vmax.f32 %v891_v5, 0.0 }
 0x232   :  { %1314 = vst [vmem:[%s2000_s4 + $0x60] sm:$0xff] %v1286_v7   ;;  %v940_v10 = vmax.f32 %v886_v8, 0.0  ;;  %v1554_v11 = vpop.f32.mrb[44].mxu1 }
 0x233   :  { %v901_v12 = vadd.f32 %v1554_v11, %v1914_v46  ;;  %v895_v13 = vpop.f32.mrb[45].mxu1 }
 0x234   :  { %v1291_v14 = vpack.c.bf16 %v941_v9, %v940_v10  ;;  %v896_v16 = vadd.f32 %v1914_v46, %v895_v13 }
 0x235   :  { %v943_v17 = vmax.f32 %v901_v12, 0.0 }
 0x236   :  { %1315 = vst [vmem:[%s2000_s4 + $0x68] sm:$0xff] %v1291_v14   ;;  %v942_v18 = vmax.f32 %v896_v16, 0.0  ;;  %v1557_v20 = vpop.f32.mrb[46].mxu1 }
 0x237   :  { %v911_v21 = vadd.f32 %v1557_v20, %v1914_v46  ;;  %v905_v22 = vpop.f32.mrb[47].mxu1 }
 0x238   :  { %v1296_v23 = vpack.c.bf16 %v943_v17, %v942_v18  ;;  %v906_v24 = vadd.f32 %v1914_v46, %v905_v22 }
 0x239   :  { %v945_v25 = vmax.f32 %v911_v21, 0.0 }
 0x23a   :  { %1316 = vst [vmem:[%s2000_s4 + $0x70] sm:$0xff] %v1296_v23   ;;  %v944_v26 = vmax.f32 %v906_v24, 0.0 }
 0x23c   :  { %v1301_v28 = vpack.c.bf16 %v945_v25, %v944_v26 }
 0x23e   :  { %1317 = vst [vmem:[%s2000_s4 + $0x78] sm:$0xff] %v1301_v28  }

</bundles_post_ra>
